<compile_context>
chip_gen: v7x
topology: tpu7x:2x2x1
jax: 0.10.0
libtpu: 0.0.40
codegen_flags: <defaults>
</compile_context>

<pallas_src>
import functools

import jax
import jax.numpy as jnp
from jax import lax
from jax.experimental import pallas as pl
from jax.experimental.pallas import tpu as pltpu


def _stable_expm1(x):
    # expm1(x) = 2*tanh(x/2) / (1 - tanh(x/2)); stable for x <= 0, uses EUP tanh.
    t = jnp.tanh(0.5 * x)
    return 2.0 * t / (1.0 - t)


def _make_fused_kernel(dilations, rows, L, cin0, cout):
    """Kernel computing all layers for one row-slab of `rows` = b_tile*L rows."""

    def kernel(x_ref, w1_ref, ws_ref, b_ref, o_ref):
        # x_ref : (rows, cin0)              channel-last input rows (batch folded into M)
        # w1_ref: (3*cin0, cout)            layer-1 weight, tap-major rows
        # ws_ref: ((n-1)*3*cout, cout)      layers 2.. weights, (layer, tap)-major rows
        # b_ref : (n_layers, cout)          biases, one row per layer
        # o_ref : (rows, cout)
        row = lax.broadcasted_iota(jnp.int32, (rows, 1), 0)
        # Within-batch-element time index (block start is always a multiple of L).
        t_idx = (row & (L - 1)) if (L & (L - 1)) == 0 else (row % L)

        h = x_ref[...]                                   # (rows, cin) f32
        for li, d in enumerate(dilations):
            bias = b_ref[li:li + 1, :]                   # (1, cout)
            base = None if li == 0 else (li - 1) * 3 * cout
            if d < L:
                # Shifted taps via XLU roll + per-row mask (zero pad AND batch
                # boundary handling in one select-free multiply).
                m_l = (t_idx >= d).astype(h.dtype)       # (rows, 1)
                m_r = (t_idx < L - d).astype(h.dtype)
                left = pltpu.roll(h, d, axis=0) * m_l          # h[t-d]
                right = pltpu.roll(h, rows - d, axis=0) * m_r  # h[t+d]
                if li == 0 and cin0 % 128 == 0:
                    # cin0 = 256: lane-tile-aligned concat -> single K=3*cin0 matmul.
                    x_cat = jnp.concatenate([left, h, right], axis=1)
                    acc = jnp.dot(x_cat, w1_ref[...],
                                  preferred_element_type=jnp.float32)
                elif li == 0:
                    acc = (jnp.dot(left, w1_ref[0:cin0, :],
                                   preferred_element_type=jnp.float32)
                           + jnp.dot(h, w1_ref[cin0:2 * cin0, :],
                                     preferred_element_type=jnp.float32)
                           + jnp.dot(right, w1_ref[2 * cin0:3 * cin0, :],
                                     preferred_element_type=jnp.float32))
                else:
                    # cin = 16: three accumulated small matmuls; weight slices are
                    # 8-aligned sublane views of the packed weight block (free).
                    acc = (jnp.dot(left, ws_ref[base:base + cout, :],
                                   preferred_element_type=jnp.float32)
                           + jnp.dot(h, ws_ref[base + cout:base + 2 * cout, :],
                                     preferred_element_type=jnp.float32)
                           + jnp.dot(right, ws_ref[base + 2 * cout:base + 3 * cout, :],
                                     preferred_element_type=jnp.float32))
            else:
                # dilation >= L: off-center taps read only zero padding -> center tap only.
                if li == 0:
                    w_c = w1_ref[cin0:2 * cin0, :]
                else:
                    w_c = ws_ref[base + cout:base + 2 * cout, :]
                acc = jnp.dot(h, w_c, preferred_element_type=jnp.float32)
            acc = acc + bias
            # ELU (alpha = 1); clamp the dead branch input to avoid overflow.
            h = jnp.where(acc > 0.0, acc, _stable_expm1(jnp.minimum(acc, 0.0)))
        o_ref[...] = h.astype(o_ref.dtype)

    return kernel


@functools.partial(jax.jit, static_argnames=("dilations",))
def dilated_conv1_forward(x, params, *, dilations):
    """x: (B, 256, L) f32 NCW (PyTorch layout).  Returns (B, 16, L) f32."""
    B, cin0, L = x.shape
    cout = params[0][0].shape[0]
    n_layers = len(dilations)

    def tapmajor(w):  # (cout, cin, 3) -> (3*cin, cout), tap-major rows (t-d, t, t+d)
        cin = w.shape[1]
        return jnp.transpose(w, (2, 1, 0)).reshape(3 * cin, w.shape[0])

    w1 = tapmajor(params[0][0])                                          # (3*cin0, cout)
    ws = jnp.concatenate([tapmajor(w) for (w, _) in params[1:]], axis=0)  # ((n-1)*3*cout, cout)
    b_all = jnp.stack([b for (_, b) in params], axis=0)                   # (n, cout)

    x_rows = jnp.transpose(x, (0, 2, 1)).reshape(B * L, cin0)             # (B*L, cin0)

    # Fold batch into the matmul M dimension.  At B=2 this is ONE grid step;
    # if B grows, pack up to 16 elements per step (M = 16*L = 256 rows, filling
    # the v6e/v7x MXU; v5e just issues two MXU passes) and shard batch tiles
    # across TensorCores via the "parallel" grid axis.
    max_bt = 16
    b_tile = B if B <= max_bt else max(t for t in range(1, max_bt + 1) if B % t == 0)
    rows = b_tile * L
    grid = (B // b_tile,)

    kernel = _make_fused_kernel(tuple(dilations), rows, L, cin0, cout)
    out = pl.pallas_call(
        kernel,
        out_shape=jax.ShapeDtypeStruct((B * L, cout), jnp.float32),
        grid=grid,
        in_specs=[
            pl.BlockSpec((rows, cin0), lambda i: (i, 0)),
            pl.BlockSpec((3 * cin0, cout), lambda i: (0, 0)),
            pl.BlockSpec(((n_layers - 1) * 3 * cout, cout), lambda i: (0, 0)),
            pl.BlockSpec((n_layers, cout), lambda i: (0, 0)),
        ],
        out_specs=pl.BlockSpec((rows, cout), lambda i: (i, 0)),
        compiler_params=pltpu.CompilerParams(dimension_semantics=("parallel",)),
    )(x_rows, w1, ws, b_all)
    return jnp.transpose(out.reshape(B, L, cout), (0, 2, 1))              # back to NCW


def init_params(key):
    """Deterministic init mimicking PyTorch Conv1d default (uniform +/-1/sqrt(fan_in))."""
    dilations = (2, 4, 8, 16, 32, 64, 128)
    in_channels = (256, 16, 16, 16, 16, 16, 16)
    out_channels = 16
    params = []
    for cin in in_channels:
        key, kw, kb = jax.random.split(key, 3)
        bound = 1.0 / jnp.sqrt(cin * 3.0)
        w = jax.random.uniform(kw, (out_channels, cin, 3), jnp.float32, -bound, bound)
        b = jax.random.uniform(kb, (out_channels,), jnp.float32, -bound, bound)
        params.append((w, b))
    return dilations, params


def _reference_forward(x, dilations, params):
    """Pure-JAX reference using lax.conv_general_dilated, for correctness check."""
    for (w, b), d in zip(params, dilations):
        y = lax.conv_general_dilated(
            x, w, window_strides=(1,), padding=[(d, d)],
            rhs_dilation=(d,), dimension_numbers=("NCH", "OIH", "NCH"))
        x = jax.nn.elu(y + b[None, :, None])
    return x


if __name__ == "__main__":
    key = jax.random.PRNGKey(0)
    key, kx = jax.random.split(key)

    B, Cin, L = 2, 256, 16  # Cin=256 is fixed by the module
    x = jax.random.normal(kx, (B, Cin, L), jnp.float32)

    dilations, params = init_params(key)

    out = dilated_conv1_forward(x, params, dilations=dilations)
    out = jax.block_until_ready(out)

    ref = jax.block_until_ready(_reference_forward(x, dilations, params))
    assert out.shape == (B, 16, L), out.shape
    assert jnp.allclose(out, ref, atol=1e-4, rtol=1e-4), float(jnp.max(jnp.abs(out - ref)))

    print("KERNEL_OK")
</pallas_src>

<mosaic_0001>
module attributes {stable_mosaic.version = 11 : i64} {
  func.func @kernel(%arg0: i32, %arg1: memref<32x256xf32, #tpu.memory_space<vmem>>, %arg2: memref<768x16xf32, #tpu.memory_space<vmem>>, %arg3: memref<288x16xf32, #tpu.memory_space<vmem>>, %arg4: memref<7x16xf32, #tpu.memory_space<vmem>>, %arg5: memref<32x16xf32, #tpu.memory_space<vmem>>) attributes {dimension_semantics = [#tpu.dimension_semantics<parallel>], iteration_bounds = array<i64: 1>, scalar_prefetch = 0 : i64, scratch_operands = 0 : i64, tpu.core_type = #tpu.core_type<tc>, window_params = [{transform_indices = @transform_0, window_bounds = array<i64: 32, 256>}, {pipeline_mode = #tpu.pipeline_mode<synchronous>, transform_indices = @transform_1, window_bounds = array<i64: 768, 16>}, {pipeline_mode = #tpu.pipeline_mode<synchronous>, transform_indices = @transform_2, window_bounds = array<i64: 288, 16>}, {pipeline_mode = #tpu.pipeline_mode<synchronous>, transform_indices = @transform_3, window_bounds = array<i64: 7, 16>}, {transform_indices = @transform_4, window_bounds = array<i64: 32, 16>}]} {
    %0 = tpu.iota {dimensions = array<i32: 0>} : vector<32x1xi32>
    %c15_i32 = arith.constant 15 : i32
    %1 = vector.broadcast %c15_i32 : i32 to vector<32x1xi32>
    %2 = arith.andi %0, %1 : vector<32x1xi32>
    %c0 = arith.constant 0 : index
    %c0_0 = arith.constant 0 : index
    %3 = vector.load %arg1[%c0, %c0_0] : memref<32x256xf32, #tpu.memory_space<vmem>>, vector<32x256xf32>
    %c0_1 = arith.constant 0 : index
    %c0_2 = arith.constant 0 : index
    %4 = vector.load %arg4[%c0_1, %c0_2] : memref<7x16xf32, #tpu.memory_space<vmem>>, vector<1x16xf32>
    %c2_i32 = arith.constant 2 : i32
    %5 = vector.broadcast %c2_i32 : i32 to vector<32x1xi32>
    %6 = arith.cmpi sge, %2, %5 : vector<32x1xi32>
    %7 = arith.extui %6 : vector<32x1xi1> to vector<32x1xi32>
    %8 = arith.sitofp %7 : vector<32x1xi32> to vector<32x1xf32>
    %c14_i32 = arith.constant 14 : i32
    %9 = vector.broadcast %c14_i32 : i32 to vector<32x1xi32>
    %10 = arith.cmpi slt, %2, %9 : vector<32x1xi32>
    %11 = arith.extui %10 : vector<32x1xi1> to vector<32x1xi32>
    %12 = arith.sitofp %11 : vector<32x1xi32> to vector<32x1xf32>
    %c2_i32_3 = arith.constant 2 : i32
    %13 = tpu.dynamic_rotate %3 by %c2_i32_3 dim 0 : vector<32x256xf32>, i32 -> vector<32x256xf32>
    %14 = vector.broadcast %8 : vector<32x1xf32> to vector<32x256xf32>
    %15 = arith.mulf %13, %14 : vector<32x256xf32>
    %c30_i32 = arith.constant 30 : i32
    %16 = tpu.dynamic_rotate %3 by %c30_i32 dim 0 : vector<32x256xf32>, i32 -> vector<32x256xf32>
    %17 = vector.broadcast %12 : vector<32x1xf32> to vector<32x256xf32>
    %18 = arith.mulf %16, %17 : vector<32x256xf32>
    %19 = tpu.concatenate %15, %3, %18 in 1 : vector<32x256xf32>, vector<32x256xf32>, vector<32x256xf32> -> vector<32x768xf32>
    %c0_4 = arith.constant 0 : index
    %c0_5 = arith.constant 0 : index
    %20 = vector.load %arg2[%c0_4, %c0_5] : memref<768x16xf32, #tpu.memory_space<vmem>>, vector<768x16xf32>
    %cst = arith.constant dense<0.000000e+00> : vector<32x16xf32>
    %21 = tpu.matmul %19, %20, %cst {dimension_numbers = #tpu.dot_dimension_numbers<[1], [0], [0], [1], [0, 0, 1, 1], [], []>} : vector<32x768xf32>, vector<768x16xf32>, vector<32x16xf32> -> vector<32x16xf32>
    %22 = vector.broadcast %4 : vector<1x16xf32> to vector<32x16xf32>
    %23 = arith.addf %21, %22 : vector<32x16xf32>
    %cst_6 = arith.constant 0.000000e+00 : f32
    %24 = vector.broadcast %cst_6 : f32 to vector<32x16xf32>
    %25 = arith.cmpf ogt, %23, %24 : vector<32x16xf32>
    %cst_7 = arith.constant 0.000000e+00 : f32
    %26 = vector.broadcast %cst_7 : f32 to vector<32x16xf32>
    %27 = arith.minimumf %23, %26 : vector<32x16xf32>
    %cst_8 = arith.constant 5.000000e-01 : f32
    %28 = vector.broadcast %cst_8 : f32 to vector<32x16xf32>
    %29 = arith.mulf %28, %27 : vector<32x16xf32>
    %30 = math.tanh %29 : vector<32x16xf32>
    %cst_9 = arith.constant 2.000000e+00 : f32
    %31 = vector.broadcast %cst_9 : f32 to vector<32x16xf32>
    %32 = arith.mulf %31, %30 : vector<32x16xf32>
    %cst_10 = arith.constant 1.000000e+00 : f32
    %33 = vector.broadcast %cst_10 : f32 to vector<32x16xf32>
    %34 = arith.subf %33, %30 : vector<32x16xf32>
    %35 = arith.divf %32, %34 : vector<32x16xf32>
    %36 = arith.select %25, %23, %35 : vector<32x16xi1>, vector<32x16xf32>
    %c1 = arith.constant 1 : index
    %c0_11 = arith.constant 0 : index
    %37 = vector.load %arg4[%c1, %c0_11] : memref<7x16xf32, #tpu.memory_space<vmem>>, vector<1x16xf32>
    %c4_i32 = arith.constant 4 : i32
    %38 = vector.broadcast %c4_i32 : i32 to vector<32x1xi32>
    %39 = arith.cmpi sge, %2, %38 : vector<32x1xi32>
    %40 = arith.extui %39 : vector<32x1xi1> to vector<32x1xi32>
    %41 = arith.sitofp %40 : vector<32x1xi32> to vector<32x1xf32>
    %c12_i32 = arith.constant 12 : i32
    %42 = vector.broadcast %c12_i32 : i32 to vector<32x1xi32>
    %43 = arith.cmpi slt, %2, %42 : vector<32x1xi32>
    %44 = arith.extui %43 : vector<32x1xi1> to vector<32x1xi32>
    %45 = arith.sitofp %44 : vector<32x1xi32> to vector<32x1xf32>
    %c4_i32_12 = arith.constant 4 : i32
    %46 = tpu.dynamic_rotate %36 by %c4_i32_12 dim 0 : vector<32x16xf32>, i32 -> vector<32x16xf32>
    %47 = vector.broadcast %41 : vector<32x1xf32> to vector<32x16xf32>
    %48 = arith.mulf %46, %47 : vector<32x16xf32>
    %c28_i32 = arith.constant 28 : i32
    %49 = tpu.dynamic_rotate %36 by %c28_i32 dim 0 : vector<32x16xf32>, i32 -> vector<32x16xf32>
    %50 = vector.broadcast %45 : vector<32x1xf32> to vector<32x16xf32>
    %51 = arith.mulf %49, %50 : vector<32x16xf32>
    %c0_13 = arith.constant 0 : index
    %c0_14 = arith.constant 0 : index
    %52 = vector.load %arg3[%c0_13, %c0_14] : memref<288x16xf32, #tpu.memory_space<vmem>>, vector<16x16xf32>
    %cst_15 = arith.constant dense<0.000000e+00> : vector<32x16xf32>
    %53 = tpu.matmul %48, %52, %cst_15 {dimension_numbers = #tpu.dot_dimension_numbers<[1], [0], [0], [1], [0, 0, 1, 1], [], []>} : vector<32x16xf32>, vector<16x16xf32>, vector<32x16xf32> -> vector<32x16xf32>
    %c16 = arith.constant 16 : index
    %c0_16 = arith.constant 0 : index
    %54 = vector.load %arg3[%c16, %c0_16] : memref<288x16xf32, #tpu.memory_space<vmem>>, vector<16x16xf32>
    %cst_17 = arith.constant dense<0.000000e+00> : vector<32x16xf32>
    %55 = tpu.matmul %36, %54, %cst_17 {dimension_numbers = #tpu.dot_dimension_numbers<[1], [0], [0], [1], [0, 0, 1, 1], [], []>} : vector<32x16xf32>, vector<16x16xf32>, vector<32x16xf32> -> vector<32x16xf32>
    %56 = arith.addf %53, %55 : vector<32x16xf32>
    %c32 = arith.constant 32 : index
    %c0_18 = arith.constant 0 : index
    %57 = vector.load %arg3[%c32, %c0_18] : memref<288x16xf32, #tpu.memory_space<vmem>>, vector<16x16xf32>
    %cst_19 = arith.constant dense<0.000000e+00> : vector<32x16xf32>
    %58 = tpu.matmul %51, %57, %cst_19 {dimension_numbers = #tpu.dot_dimension_numbers<[1], [0], [0], [1], [0, 0, 1, 1], [], []>} : vector<32x16xf32>, vector<16x16xf32>, vector<32x16xf32> -> vector<32x16xf32>
    %59 = arith.addf %56, %58 : vector<32x16xf32>
    %60 = vector.broadcast %37 : vector<1x16xf32> to vector<32x16xf32>
    %61 = arith.addf %59, %60 : vector<32x16xf32>
    %cst_20 = arith.constant 0.000000e+00 : f32
    %62 = vector.broadcast %cst_20 : f32 to vector<32x16xf32>
    %63 = arith.cmpf ogt, %61, %62 : vector<32x16xf32>
    %cst_21 = arith.constant 0.000000e+00 : f32
    %64 = vector.broadcast %cst_21 : f32 to vector<32x16xf32>
    %65 = arith.minimumf %61, %64 : vector<32x16xf32>
    %cst_22 = arith.constant 5.000000e-01 : f32
    %66 = vector.broadcast %cst_22 : f32 to vector<32x16xf32>
    %67 = arith.mulf %66, %65 : vector<32x16xf32>
    %68 = math.tanh %67 : vector<32x16xf32>
    %cst_23 = arith.constant 2.000000e+00 : f32
    %69 = vector.broadcast %cst_23 : f32 to vector<32x16xf32>
    %70 = arith.mulf %69, %68 : vector<32x16xf32>
    %cst_24 = arith.constant 1.000000e+00 : f32
    %71 = vector.broadcast %cst_24 : f32 to vector<32x16xf32>
    %72 = arith.subf %71, %68 : vector<32x16xf32>
    %73 = arith.divf %70, %72 : vector<32x16xf32>
    %74 = arith.select %63, %61, %73 : vector<32x16xi1>, vector<32x16xf32>
    %c2 = arith.constant 2 : index
    %c0_25 = arith.constant 0 : index
    %75 = vector.load %arg4[%c2, %c0_25] : memref<7x16xf32, #tpu.memory_space<vmem>>, vector<1x16xf32>
    %c8_i32 = arith.constant 8 : i32
    %76 = vector.broadcast %c8_i32 : i32 to vector<32x1xi32>
    %77 = arith.cmpi sge, %2, %76 : vector<32x1xi32>
    %78 = arith.extui %77 : vector<32x1xi1> to vector<32x1xi32>
    %79 = arith.sitofp %78 : vector<32x1xi32> to vector<32x1xf32>
    %c8_i32_26 = arith.constant 8 : i32
    %80 = vector.broadcast %c8_i32_26 : i32 to vector<32x1xi32>
    %81 = arith.cmpi slt, %2, %80 : vector<32x1xi32>
    %82 = arith.extui %81 : vector<32x1xi1> to vector<32x1xi32>
    %83 = arith.sitofp %82 : vector<32x1xi32> to vector<32x1xf32>
    %c8_i32_27 = arith.constant 8 : i32
    %84 = tpu.dynamic_rotate %74 by %c8_i32_27 dim 0 : vector<32x16xf32>, i32 -> vector<32x16xf32>
    %85 = vector.broadcast %79 : vector<32x1xf32> to vector<32x16xf32>
    %86 = arith.mulf %84, %85 : vector<32x16xf32>
    %c24_i32 = arith.constant 24 : i32
    %87 = tpu.dynamic_rotate %74 by %c24_i32 dim 0 : vector<32x16xf32>, i32 -> vector<32x16xf32>
    %88 = vector.broadcast %83 : vector<32x1xf32> to vector<32x16xf32>
    %89 = arith.mulf %87, %88 : vector<32x16xf32>
    %c48 = arith.constant 48 : index
    %c0_28 = arith.constant 0 : index
    %90 = vector.load %arg3[%c48, %c0_28] : memref<288x16xf32, #tpu.memory_space<vmem>>, vector<16x16xf32>
    %cst_29 = arith.constant dense<0.000000e+00> : vector<32x16xf32>
    %91 = tpu.matmul %86, %90, %cst_29 {dimension_numbers = #tpu.dot_dimension_numbers<[1], [0], [0], [1], [0, 0, 1, 1], [], []>} : vector<32x16xf32>, vector<16x16xf32>, vector<32x16xf32> -> vector<32x16xf32>
    %c64 = arith.constant 64 : index
    %c0_30 = arith.constant 0 : index
    %92 = vector.load %arg3[%c64, %c0_30] : memref<288x16xf32, #tpu.memory_space<vmem>>, vector<16x16xf32>
    %cst_31 = arith.constant dense<0.000000e+00> : vector<32x16xf32>
    %93 = tpu.matmul %74, %92, %cst_31 {dimension_numbers = #tpu.dot_dimension_numbers<[1], [0], [0], [1], [0, 0, 1, 1], [], []>} : vector<32x16xf32>, vector<16x16xf32>, vector<32x16xf32> -> vector<32x16xf32>
    %94 = arith.addf %91, %93 : vector<32x16xf32>
    %c80 = arith.constant 80 : index
    %c0_32 = arith.constant 0 : index
    %95 = vector.load %arg3[%c80, %c0_32] : memref<288x16xf32, #tpu.memory_space<vmem>>, vector<16x16xf32>
    %cst_33 = arith.constant dense<0.000000e+00> : vector<32x16xf32>
    %96 = tpu.matmul %89, %95, %cst_33 {dimension_numbers = #tpu.dot_dimension_numbers<[1], [0], [0], [1], [0, 0, 1, 1], [], []>} : vector<32x16xf32>, vector<16x16xf32>, vector<32x16xf32> -> vector<32x16xf32>
    %97 = arith.addf %94, %96 : vector<32x16xf32>
    %98 = vector.broadcast %75 : vector<1x16xf32> to vector<32x16xf32>
    %99 = arith.addf %97, %98 : vector<32x16xf32>
    %cst_34 = arith.constant 0.000000e+00 : f32
    %100 = vector.broadcast %cst_34 : f32 to vector<32x16xf32>
    %101 = arith.cmpf ogt, %99, %100 : vector<32x16xf32>
    %cst_35 = arith.constant 0.000000e+00 : f32
    %102 = vector.broadcast %cst_35 : f32 to vector<32x16xf32>
    %103 = arith.minimumf %99, %102 : vector<32x16xf32>
    %cst_36 = arith.constant 5.000000e-01 : f32
    %104 = vector.broadcast %cst_36 : f32 to vector<32x16xf32>
    %105 = arith.mulf %104, %103 : vector<32x16xf32>
    %106 = math.tanh %105 : vector<32x16xf32>
    %cst_37 = arith.constant 2.000000e+00 : f32
    %107 = vector.broadcast %cst_37 : f32 to vector<32x16xf32>
    %108 = arith.mulf %107, %106 : vector<32x16xf32>
    %cst_38 = arith.constant 1.000000e+00 : f32
    %109 = vector.broadcast %cst_38 : f32 to vector<32x16xf32>
    %110 = arith.subf %109, %106 : vector<32x16xf32>
    %111 = arith.divf %108, %110 : vector<32x16xf32>
    %112 = arith.select %101, %99, %111 : vector<32x16xi1>, vector<32x16xf32>
    %c3 = arith.constant 3 : index
    %c0_39 = arith.constant 0 : index
    %113 = vector.load %arg4[%c3, %c0_39] : memref<7x16xf32, #tpu.memory_space<vmem>>, vector<1x16xf32>
    %c112 = arith.constant 112 : index
    %c0_40 = arith.constant 0 : index
    %114 = vector.load %arg3[%c112, %c0_40] : memref<288x16xf32, #tpu.memory_space<vmem>>, vector<16x16xf32>
    %cst_41 = arith.constant dense<0.000000e+00> : vector<32x16xf32>
    %115 = tpu.matmul %112, %114, %cst_41 {dimension_numbers = #tpu.dot_dimension_numbers<[1], [0], [0], [1], [0, 0, 1, 1], [], []>} : vector<32x16xf32>, vector<16x16xf32>, vector<32x16xf32> -> vector<32x16xf32>
    %116 = vector.broadcast %113 : vector<1x16xf32> to vector<32x16xf32>
    %117 = arith.addf %115, %116 : vector<32x16xf32>
    %cst_42 = arith.constant 0.000000e+00 : f32
    %118 = vector.broadcast %cst_42 : f32 to vector<32x16xf32>
    %119 = arith.cmpf ogt, %117, %118 : vector<32x16xf32>
    %cst_43 = arith.constant 0.000000e+00 : f32
    %120 = vector.broadcast %cst_43 : f32 to vector<32x16xf32>
    %121 = arith.minimumf %117, %120 : vector<32x16xf32>
    %cst_44 = arith.constant 5.000000e-01 : f32
    %122 = vector.broadcast %cst_44 : f32 to vector<32x16xf32>
    %123 = arith.mulf %122, %121 : vector<32x16xf32>
    %124 = math.tanh %123 : vector<32x16xf32>
    %cst_45 = arith.constant 2.000000e+00 : f32
    %125 = vector.broadcast %cst_45 : f32 to vector<32x16xf32>
    %126 = arith.mulf %125, %124 : vector<32x16xf32>
    %cst_46 = arith.constant 1.000000e+00 : f32
    %127 = vector.broadcast %cst_46 : f32 to vector<32x16xf32>
    %128 = arith.subf %127, %124 : vector<32x16xf32>
    %129 = arith.divf %126, %128 : vector<32x16xf32>
    %130 = arith.select %119, %117, %129 : vector<32x16xi1>, vector<32x16xf32>
    %c4 = arith.constant 4 : index
    %c0_47 = arith.constant 0 : index
    %131 = vector.load %arg4[%c4, %c0_47] : memref<7x16xf32, #tpu.memory_space<vmem>>, vector<1x16xf32>
    %c160 = arith.constant 160 : index
    %c0_48 = arith.constant 0 : index
    %132 = vector.load %arg3[%c160, %c0_48] : memref<288x16xf32, #tpu.memory_space<vmem>>, vector<16x16xf32>
    %cst_49 = arith.constant dense<0.000000e+00> : vector<32x16xf32>
    %133 = tpu.matmul %130, %132, %cst_49 {dimension_numbers = #tpu.dot_dimension_numbers<[1], [0], [0], [1], [0, 0, 1, 1], [], []>} : vector<32x16xf32>, vector<16x16xf32>, vector<32x16xf32> -> vector<32x16xf32>
    %134 = vector.broadcast %131 : vector<1x16xf32> to vector<32x16xf32>
    %135 = arith.addf %133, %134 : vector<32x16xf32>
    %cst_50 = arith.constant 0.000000e+00 : f32
    %136 = vector.broadcast %cst_50 : f32 to vector<32x16xf32>
    %137 = arith.cmpf ogt, %135, %136 : vector<32x16xf32>
    %cst_51 = arith.constant 0.000000e+00 : f32
    %138 = vector.broadcast %cst_51 : f32 to vector<32x16xf32>
    %139 = arith.minimumf %135, %138 : vector<32x16xf32>
    %cst_52 = arith.constant 5.000000e-01 : f32
    %140 = vector.broadcast %cst_52 : f32 to vector<32x16xf32>
    %141 = arith.mulf %140, %139 : vector<32x16xf32>
    %142 = math.tanh %141 : vector<32x16xf32>
    %cst_53 = arith.constant 2.000000e+00 : f32
    %143 = vector.broadcast %cst_53 : f32 to vector<32x16xf32>
    %144 = arith.mulf %143, %142 : vector<32x16xf32>
    %cst_54 = arith.constant 1.000000e+00 : f32
    %145 = vector.broadcast %cst_54 : f32 to vector<32x16xf32>
    %146 = arith.subf %145, %142 : vector<32x16xf32>
    %147 = arith.divf %144, %146 : vector<32x16xf32>
    %148 = arith.select %137, %135, %147 : vector<32x16xi1>, vector<32x16xf32>
    %c5 = arith.constant 5 : index
    %c0_55 = arith.constant 0 : index
    %149 = vector.load %arg4[%c5, %c0_55] : memref<7x16xf32, #tpu.memory_space<vmem>>, vector<1x16xf32>
    %c208 = arith.constant 208 : index
    %c0_56 = arith.constant 0 : index
    %150 = vector.load %arg3[%c208, %c0_56] : memref<288x16xf32, #tpu.memory_space<vmem>>, vector<16x16xf32>
    %cst_57 = arith.constant dense<0.000000e+00> : vector<32x16xf32>
    %151 = tpu.matmul %148, %150, %cst_57 {dimension_numbers = #tpu.dot_dimension_numbers<[1], [0], [0], [1], [0, 0, 1, 1], [], []>} : vector<32x16xf32>, vector<16x16xf32>, vector<32x16xf32> -> vector<32x16xf32>
    %152 = vector.broadcast %149 : vector<1x16xf32> to vector<32x16xf32>
    %153 = arith.addf %151, %152 : vector<32x16xf32>
    %cst_58 = arith.constant 0.000000e+00 : f32
    %154 = vector.broadcast %cst_58 : f32 to vector<32x16xf32>
    %155 = arith.cmpf ogt, %153, %154 : vector<32x16xf32>
    %cst_59 = arith.constant 0.000000e+00 : f32
    %156 = vector.broadcast %cst_59 : f32 to vector<32x16xf32>
    %157 = arith.minimumf %153, %156 : vector<32x16xf32>
    %cst_60 = arith.constant 5.000000e-01 : f32
    %158 = vector.broadcast %cst_60 : f32 to vector<32x16xf32>
    %159 = arith.mulf %158, %157 : vector<32x16xf32>
    %160 = math.tanh %159 : vector<32x16xf32>
    %cst_61 = arith.constant 2.000000e+00 : f32
    %161 = vector.broadcast %cst_61 : f32 to vector<32x16xf32>
    %162 = arith.mulf %161, %160 : vector<32x16xf32>
    %cst_62 = arith.constant 1.000000e+00 : f32
    %163 = vector.broadcast %cst_62 : f32 to vector<32x16xf32>
    %164 = arith.subf %163, %160 : vector<32x16xf32>
    %165 = arith.divf %162, %164 : vector<32x16xf32>
    %166 = arith.select %155, %153, %165 : vector<32x16xi1>, vector<32x16xf32>
    %c6 = arith.constant 6 : index
    %c0_63 = arith.constant 0 : index
    %167 = vector.load %arg4[%c6, %c0_63] : memref<7x16xf32, #tpu.memory_space<vmem>>, vector<1x16xf32>
    %c256 = arith.constant 256 : index
    %c0_64 = arith.constant 0 : index
    %168 = vector.load %arg3[%c256, %c0_64] : memref<288x16xf32, #tpu.memory_space<vmem>>, vector<16x16xf32>
    %cst_65 = arith.constant dense<0.000000e+00> : vector<32x16xf32>
    %169 = tpu.matmul %166, %168, %cst_65 {dimension_numbers = #tpu.dot_dimension_numbers<[1], [0], [0], [1], [0, 0, 1, 1], [], []>} : vector<32x16xf32>, vector<16x16xf32>, vector<32x16xf32> -> vector<32x16xf32>
    %170 = vector.broadcast %167 : vector<1x16xf32> to vector<32x16xf32>
    %171 = arith.addf %169, %170 : vector<32x16xf32>
    %cst_66 = arith.constant 0.000000e+00 : f32
    %172 = vector.broadcast %cst_66 : f32 to vector<32x16xf32>
    %173 = arith.cmpf ogt, %171, %172 : vector<32x16xf32>
    %cst_67 = arith.constant 0.000000e+00 : f32
    %174 = vector.broadcast %cst_67 : f32 to vector<32x16xf32>
    %175 = arith.minimumf %171, %174 : vector<32x16xf32>
    %cst_68 = arith.constant 5.000000e-01 : f32
    %176 = vector.broadcast %cst_68 : f32 to vector<32x16xf32>
    %177 = arith.mulf %176, %175 : vector<32x16xf32>
    %178 = math.tanh %177 : vector<32x16xf32>
    %cst_69 = arith.constant 2.000000e+00 : f32
    %179 = vector.broadcast %cst_69 : f32 to vector<32x16xf32>
    %180 = arith.mulf %179, %178 : vector<32x16xf32>
    %cst_70 = arith.constant 1.000000e+00 : f32
    %181 = vector.broadcast %cst_70 : f32 to vector<32x16xf32>
    %182 = arith.subf %181, %178 : vector<32x16xf32>
    %183 = arith.divf %180, %182 : vector<32x16xf32>
    %184 = arith.select %173, %171, %183 : vector<32x16xi1>, vector<32x16xf32>
    %c0_71 = arith.constant 0 : index
    %c0_72 = arith.constant 0 : index
    %185 = vector.load %arg5[%c0_71, %c0_72] : memref<32x16xf32, #tpu.memory_space<vmem>>, vector<32x16xf32>
    tpu.vector_store %arg5[%c0_71, %c0_72], %184 {strides = array<i32>} : memref<32x16xf32, #tpu.memory_space<vmem>>, vector<32x16xf32>,
    return
  }
  func.func @transform_0(%arg0: i32) -> (i32, i32) {
    %c0_i32 = arith.constant 0 : i32
    %c0_i32_0 = arith.constant 0 : i32
    return %arg0, %c0_i32 : i32, i32
  }
  func.func @transform_1(%arg0: i32) -> (i32, i32) {
    %c0_i32 = arith.constant 0 : i32
    %c0_i32_0 = arith.constant 0 : i32
    %c0_i32_1 = arith.constant 0 : i32
    return %c0_i32, %c0_i32_0 : i32, i32
  }
  func.func @transform_2(%arg0: i32) -> (i32, i32) {
    %c0_i32 = arith.constant 0 : i32
    %c0_i32_0 = arith.constant 0 : i32
    %c0_i32_1 = arith.constant 0 : i32
    return %c0_i32, %c0_i32_0 : i32, i32
  }
  func.func @transform_3(%arg0: i32) -> (i32, i32) {
    %c0_i32 = arith.constant 0 : i32
    %c0_i32_0 = arith.constant 0 : i32
    %c0_i32_1 = arith.constant 0 : i32
    return %c0_i32, %c0_i32_0 : i32, i32
  }
  func.func @transform_4(%arg0: i32) -> (i32, i32) {
    %c0_i32 = arith.constant 0 : i32
    %c0_i32_0 = arith.constant 0 : i32
    return %arg0, %c0_i32 : i32, i32
  }
}

</mosaic_0001>

<bundles_post_ra>
// kernel: dilated_conv1_forward.1
= control target key start
LH: loop header
LB: loop body
LE: loop exit
PB: predicated region body
PF: predicated region fallthrough
CT: control target
= control target key end

     0   :  { %v17_v33 = vlaneseq  ;;  %vm546_vm6 = vcmask 130048   ;;  %s3065_s1 = inlined_call_operand.vmem [shape: f32[768,16], index: 1, kind: input, shape index: {}]   ;;  %s3066_s0 = inlined_call_operand.vmem [shape: f32[32,256], index: 0, kind: input, shape index: {}]   ;;  %s3067_s2 = inlined_call_operand.vmem [shape: f32[288,16], index: 2, kind: input, shape index: {}]   ;;  %s3068_s3 = inlined_call_operand.vmem [shape: f32[7,16], index: 3, kind: input, shape index: {}]   ;;  %s3069_s4 = inlined_call_operand.vmem [shape: f32[32,16], index: 4, kind: output, shape index: {}]  }
   0x1   :  { %v125_v0 = vld [vmem:[%s3065_s1 + $0x80] sm:$0xff]  ;;  %v126_v1 = vld [vmem:[%s3065_s1 + $0x88] sm:$0xff]  ;;  %v127_v11 = vld [vmem:[%s3065_s1 + $0x90] sm:$0xff] }
   0x2   :  { %v109_v2 = vld [vmem:[%s3065_s1] sm:$0xff]  ;;  %v2181_v3 = vpack.c.bf16 %v126_v1, %v125_v0  ;;  %v110_v4 = vld [vmem:[%s3065_s1 + $0x8] sm:$0xff]  ;;  %v128_v13 = vld [vmem:[%s3065_s1 + $0x98] sm:$0xff]  ;;  %v2574_v49 = vshrl.u32 %v17_v33, 7 }
   0x3   :  { %v157_v5 = vld [vmem:[%s3065_s1 + $0x180] sm:$0xff]  ;;  %v158_v6 = vld [vmem:[%s3065_s1 + $0x188] sm:$0xff]  ;;  %v2183_v7 = vpack.c.bf16 %v110_v4, %v109_v2  ;;  %v111_v14 = vld [vmem:[%s3065_s1 + $0x10] sm:$0xff]  ;;  %v2185_v16 = vpack.c.bf16 %v128_v13, %v127_v11 }
   0x4   :  { %v2213_v8 = vpack.c.bf16 %v158_v6, %v157_v5  ;;  %v141_v9 = vld [vmem:[%s3065_s1 + $0x100] sm:$0xff]  ;;  %v142_v10 = vld [vmem:[%s3065_s1 + $0x108] sm:$0xff]  ;;  %2182 = vmatprep.subr.bf16.mxu0 %v2181_v3  ;;  %v112_v15 = vld [vmem:[%s3065_s1 + $0x18] sm:$0xff]  ;;  %v22_v0 = vand.u32 15, %v2574_v49  ;;  %vm67_vm1 = vcmp.lt.s32.totalorder %v2574_v49, 2  ;;  %vm92_vm3 = vcmp.lt.s32.totalorder %v2574_v49, 6 }
   0x5   :  { %v2215_v12 = vpack.c.bf16 %v142_v10, %v141_v9  ;;  %2184 = vmatpush3.bf16.msra.mxu0 %v2183_v7  ;;  %v2187_v17 = vpack.c.bf16 %v112_v15, %v111_v14  ;;  %v159_v18 = vld [vmem:[%s3065_s1 + $0x190] sm:$0xff]  ;;  %v160_v19 = vld [vmem:[%s3065_s1 + $0x198] sm:$0xff]  ;;  %v129_v23 = vld [vmem:[%s3065_s1 + $0xa0] sm:$0xff]  ;;  %vm529_vm9 = vcmp.lt.s32.totalorder %v2574_v49, 4 }
   0x6   :  { %2214 = vmatprep.subr.bf16.mxu1 %v2213_v8  ;;  %v143_v20 = vld [vmem:[%s3065_s1 + $0x110] sm:$0xff]  ;;  %v2217_v21 = vpack.c.bf16 %v160_v19, %v159_v18  ;;  %v144_v22 = vld [vmem:[%s3065_s1 + $0x118] sm:$0xff]  ;;  %v130_v24 = vld [vmem:[%s3065_s1 + $0xa8] sm:$0xff]  ;;  %2186 = vmatprep.subr.bf16.mxu0 %v2185_v16  ;;  %vm2636_vm0 = vcmp.ge.s32.totalorder %v22_v0, 2  ;;  %vm501_vm12 = vcmp.ge.s32.totalorder %v22_v0, 4 }
   0x7   :  { %2216 = vmatpush3.bf16.msra.mxu1 %v2215_v12  ;;  %v2219_v25 = vpack.c.bf16 %v144_v22, %v143_v20  ;;  %v2189_v26 = vpack.c.bf16 %v130_v24, %v129_v23  ;;  %v113_v27 = vld [vmem:[%s3065_s1 + $0x20] sm:$0xff]  ;;  %v114_v28 = vld [vmem:[%s3065_s1 + $0x28] sm:$0xff]  ;;  %v131_v36 = vld [vmem:[%s3065_s1 + $0xb0] sm:$0xff] }
   0x8   :  { %v161_v29 = vld [vmem:[%s3065_s1 + $0x1a0] sm:$0xff]  ;;  %2218 = vmatprep.subr.bf16.mxu1 %v2217_v21  ;;  %v162_v30 = vld [vmem:[%s3065_s1 + $0x1a8] sm:$0xff]  ;;  %v2191_v34 = vpack.c.bf16 %v114_v28, %v113_v27  ;;  %v132_v37 = vld [vmem:[%s3065_s1 + $0xb8] sm:$0xff]  ;;  %v2446_v28 = vmov 0.0  }
   0x9   :  { %v145_v31 = vld [vmem:[%s3065_s1 + $0x120] sm:$0xff]  ;;  %v146_v32 = vld [vmem:[%s3065_s1 + $0x128] sm:$0xff]  ;;  %2188 = vmatpush3.bf16.msra.mxu0 %v2187_v17  ;;  %v2221_v35 = vpack.c.bf16 %v162_v30, %v161_v29  ;;  %v115_v38 = vld [vmem:[%s3065_s1 + $0x30] sm:$0xff]  ;;  %v2193_v40 = vpack.c.bf16 %v132_v37, %v131_v36  ;;  %v1834_v29 = vsel %vm2636_vm0, 1.0, %v2446_v28 }
   0xa   :  { %2190 = vmatprep.subr.bf16.mxu0 %v2189_v26  ;;  %v2223_v39 = vpack.c.bf16 %v146_v32, %v145_v31  ;;  %v116_v41 = vld [vmem:[%s3065_s1 + $0x38] sm:$0xff]  ;;  %v163_v42 = vld [vmem:[%s3065_s1 + $0x1b0] sm:$0xff]  ;;  %v133_v47 = vld [vmem:[%s3065_s1 + $0xc0] sm:$0xff] }
   0xb   :  { %2220 = vmatpush3.bf16.msra.mxu1 %v2219_v25  ;;  %v164_v43 = vld [vmem:[%s3065_s1 + $0x1b8] sm:$0xff]  ;;  %v147_v45 = vld [vmem:[%s3065_s1 + $0x130] sm:$0xff]  ;;  %v134_v48 = vld [vmem:[%s3065_s1 + $0xc8] sm:$0xff]  ;;  %v2195_v50 = vpack.c.bf16 %v116_v41, %v115_v38 }
   0xc   :  { %2222 = vmatprep.subr.bf16.mxu1 %v2221_v35  ;;  %v2225_v44 = vpack.c.bf16 %v164_v43, %v163_v42  ;;  %v148_v46 = vld [vmem:[%s3065_s1 + $0x138] sm:$0xff]  ;;  %v165_v51 = vld [vmem:[%s3065_s1 + $0x1c0] sm:$0xff]  ;;  %v166_v52 = vld [vmem:[%s3065_s1 + $0x1c8] sm:$0xff]  ;;  %v2197_v54 = vpack.c.bf16 %v134_v48, %v133_v47 }
   0xd   :  { %2192 = vmatpush3.bf16.msra.mxu0 %v2191_v34  ;;  %v2227_v53 = vpack.c.bf16 %v148_v46, %v147_v45  ;;  %v117_v55 = vld [vmem:[%s3065_s1 + $0x40] sm:$0xff]  ;;  %v118_v56 = vld [vmem:[%s3065_s1 + $0x48] sm:$0xff]  ;;  %v2229_v58 = vpack.c.bf16 %v166_v52, %v165_v51  ;;  %v135_v60 = vld [vmem:[%s3065_s1 + $0xd0] sm:$0xff]  ;;  %v2689_v34 = vadd.s32 16, %v2574_v49 }
   0xe   :  { %2194 = vmatprep.subr.bf16.mxu0 %v2193_v40  ;;  %v149_v57 = vld [vmem:[%s3065_s1 + $0x140] sm:$0xff]  ;;  %v150_v59 = vld [vmem:[%s3065_s1 + $0x148] sm:$0xff]  ;;  %v136_v61 = vld [vmem:[%s3065_s1 + $0xd8] sm:$0xff]  ;;  %v2199_v1 = vpack.c.bf16 %v118_v56, %v117_v55 }
   0xf   :  { %2224 = vmatpush3.bf16.msra.mxu1 %v2223_v39  ;;  %v167_v62 = vld [vmem:[%s3065_s1 + $0x1d0] sm:$0xff]  ;;  %v168_v63 = vld [vmem:[%s3065_s1 + $0x1d8] sm:$0xff]  ;;  %v2231_v2 = vpack.c.bf16 %v150_v59, %v149_v57  ;;  %v2201_v3 = vpack.c.bf16 %v136_v61, %v135_v60  ;;  %v137_v9 = vld [vmem:[%s3065_s1 + $0xe0] sm:$0xff] }
  0x10   :  { %2226 = vmatprep.subr.bf16.mxu1 %v2225_v44  ;;  %v119_v4 = vld [vmem:[%s3065_s1 + $0x50] sm:$0xff]  ;;  %v120_v5 = vld [vmem:[%s3065_s1 + $0x58] sm:$0xff]  ;;  %v2233_v7 = vpack.c.bf16 %v168_v63, %v167_v62  ;;  %v138_v10 = vld [vmem:[%s3065_s1 + $0xe8] sm:$0xff] }
  0x11   :  { %2196 = vmatpush3.bf16.msra.mxu0 %v2195_v50  ;;  %v151_v6 = vld [vmem:[%s3065_s1 + $0x150] sm:$0xff]  ;;  %v152_v8 = vld [vmem:[%s3065_s1 + $0x158] sm:$0xff]  ;;  %v121_v11 = vld [vmem:[%s3065_s1 + $0x60] sm:$0xff]  ;;  %v2203_v15 = vpack.c.bf16 %v120_v5, %v119_v4  ;;  %v2205_v20 = vpack.c.bf16 %v138_v10, %v137_v9  ;;  %v24_v50 = vand.u32 15, %v2689_v34 }
  0x12   :  { %2198 = vmatprep.subr.bf16.mxu0 %v2197_v54  ;;  %v169_v12 = vld [vmem:[%s3065_s1 + $0x1e0] sm:$0xff]  ;;  %v170_v13 = vld [vmem:[%s3065_s1 + $0x1e8] sm:$0xff]  ;;  %v2235_v19 = vpack.c.bf16 %v152_v8, %v151_v6  ;;  %v2659_v22 = vld [vmem:[%s3066_s0 + $0x30] sm:$0xff] }
  0x13   :  { %2228 = vmatpush3.bf16.msra.mxu1 %v2227_v53  ;;  %v122_v16 = vld [vmem:[%s3065_s1 + $0x68] sm:$0xff]  ;;  %v153_v17 = vld [vmem:[%s3065_s1 + $0x160] sm:$0xff]  ;;  %v2664_v23 = vld [vmem:[%s3066_s0 + $0x38] sm:$0xff]  ;;  %v2237_v24 = vpack.c.bf16 %v170_v13, %v169_v12  ;;  %v65_v37 = vrot.slane %v2659_v22, 6  ;;  %vm37_vm2 = vcmp.ge.s32.totalorder %v24_v50, 2  ;;  %vm503_vm14 = vcmp.ge.s32.totalorder %v24_v50, 4 }
  0x14   :  { %2230 = vmatprep.subr.bf16.mxu1 %v2229_v58  ;;  %v2649_v18 = vld [vmem:[%s3066_s0] sm:$0xff]  ;;  %v2654_v21 = vld [vmem:[%s3066_s0 + $0x8] sm:$0xff]  ;;  %v139_v26 = vld [vmem:[%s3065_s1 + $0xf0] sm:$0xff]  ;;  %v66_v31 = vrot.slane %v2664_v23, 6  ;;  %v2207_v35 = vpack.c.bf16 %v122_v16, %v121_v11  ;;  %v1835_v12 = vsel %vm37_vm2, 1.0, %v2446_v28  ;;  %v1840_v0 = vsel %vm503_vm14, 1.0, %v2446_v28 }
  0x15   :  { %2200 = vmatpush3.bf16.msra.mxu0 %v2199_v1  ;;  %v154_v25 = vld [vmem:[%s3065_s1 + $0x168] sm:$0xff]  ;;  %v140_v27 = vld [vmem:[%s3065_s1 + $0xf8] sm:$0xff]  ;;  %v60_v30 = vrot.slane %v2654_v21, 6  ;;  %358 = vmatprep.mubr.f32.mxu1 %v2654_v21  ;;  %v171_v32 = vld [vmem:[%s3065_s1 + $0x1f0] sm:$0xff]  ;;  %v59_v36 = vrot.slane %v2649_v18, 6 }
  0x16   :  { %2202 = vmatprep.subr.bf16.mxu0 %v2201_v3  ;;  %v172_v33 = vld [vmem:[%s3065_s1 + $0x1f8] sm:$0xff]  ;;  %v2239_v39 = vpack.c.bf16 %v154_v25, %v153_v17  ;;  %v2209_v40 = vpack.c.bf16 %v140_v27, %v139_v26  ;;  %v123_v41 = vld [vmem:[%s3065_s1 + $0x70] sm:$0xff]  ;;  %v189_v47 = vld [vmem:[%s3065_s1 + $0x280] sm:$0xff] }
  0x17   :  { %2232 = vmatpush3.bf16.msra.mxu1 %v2231_v2  ;;  %v75_v38 = vsel %vm67_vm1, %v66_v31, %v60_v30  ;;  %v124_v42 = vld [vmem:[%s3065_s1 + $0x78] sm:$0xff]  ;;  %v155_v44 = vld [vmem:[%s3065_s1 + $0x170] sm:$0xff]  ;;  %v2241_v45 = vpack.c.bf16 %v172_v33, %v171_v32  ;;  %v190_v48 = vld [vmem:[%s3065_s1 + $0x288] sm:$0xff]  ;;  %v74_v52 = vsel %vm67_vm1, %v65_v37, %v59_v36 }
  0x18   :  { %2234 = vmatprep.subr.bf16.mxu1 %v2233_v7  ;;  %v77_v43 = vmul.f32 %v1834_v29, %v75_v38  ;;  %v156_v46 = vld [vmem:[%s3065_s1 + $0x178] sm:$0xff]  ;;  %v2211_v51 = vpack.c.bf16 %v124_v42, %v123_v41  ;;  %v173_v53 = vld [vmem:[%s3065_s1 + $0x200] sm:$0xff]  ;;  %v2245_v55 = vpack.c.bf16 %v190_v48, %v189_v47  ;;  %v174_v56 = vld [vmem:[%s3065_s1 + $0x208] sm:$0xff]  ;;  %v76_v62 = vmul.f32 %v1834_v29, %v74_v52 }
  0x19   :  { %2204 = vmatpush3.bf16.msra.mxu0 %v2203_v15  ;;  %v2243_v54 = vpack.c.bf16 %v156_v46, %v155_v44  ;;  %v2729_v57 = vld [vmem:[%s3066_s0 + $0x18] sm:$0xff]  ;;  %v2734_v58 = vld [vmem:[%s3066_s0 + $0x10] sm:$0xff]  ;;  %v2746_v63 = vld [vmem:[%s3066_s0 + $0x28] sm:$0xff]  ;;  %v2247_v2 = vpack.c.bf16 %v174_v56, %v173_v53 }
  0x1a   :  { %2206 = vmatprep.subr.bf16.mxu0 %v2205_v20  ;;  %273 = vmatprep.mubr.f32.mxu0 %v77_v43  ;;  %v191_v59 = vld [vmem:[%s3065_s1 + $0x290] sm:$0xff]  ;;  %v192_v60 = vld [vmem:[%s3065_s1 + $0x298] sm:$0xff]  ;;  %v62_v61 = vrot.slane %v2729_v57, 6  ;;  %v2753_v1 = vld [vmem:[%s3066_s0 + $0x20] sm:$0xff]  ;;  %v61_v3 = vrot.slane %v2734_v58, 6  ;;  %v64_v4 = vrot.slane %v2746_v63, 6 }
  0x1b   :  { %2236 = vmatpush3.bf16.msra.mxu1 %v2235_v19  ;;  %v2249_v5 = vpack.c.bf16 %v192_v60, %v191_v59  ;;  %v175_v6 = vld [vmem:[%s3065_s1 + $0x210] sm:$0xff]  ;;  %v176_v7 = vld [vmem:[%s3065_s1 + $0x218] sm:$0xff]  ;;  %v63_v8 = vrot.slane %v2753_v1, 6  ;;  %v193_v9 = vld [vmem:[%s3065_s1 + $0x2a0] sm:$0xff] }
  0x1c   :  { %2238 = vmatprep.subr.bf16.mxu1 %v2237_v24  ;;  %v194_v10 = vld [vmem:[%s3065_s1 + $0x2a8] sm:$0xff]  ;;  %v73_v11 = vsel %vm67_vm1, %v60_v30, %v62_v61  ;;  %v71_v13 = vsel %vm67_vm1, %v62_v61, %v64_v4  ;;  %v2251_v14 = vpack.c.bf16 %v176_v7, %v175_v6  ;;  %v72_v15 = vsel %vm67_vm1, %v59_v36, %v61_v3  ;;  %v177_v19 = vld [vmem:[%s3065_s1 + $0x220] sm:$0xff]  ;;  %v195_v25 = vld [vmem:[%s3065_s1 + $0x2b0] sm:$0xff] }
  0x1d   :  { %2208 = vmatpush3.bf16.msra.mxu0 %v2207_v35  ;;  %v70_v16 = vsel %vm67_vm1, %v61_v3, %v63_v8  ;;  %v2253_v17 = vpack.c.bf16 %v194_v10, %v193_v9  ;;  %v178_v20 = vld [vmem:[%s3065_s1 + $0x228] sm:$0xff]  ;;  %v81_v24 = vmul.f32 %v1835_v12, %v71_v13  ;;  %v196_v26 = vld [vmem:[%s3065_s1 + $0x2b8] sm:$0xff]  ;;  %v179_v32 = vld [vmem:[%s3065_s1 + $0x230] sm:$0xff]  ;;  %v69_v38 = vsel %vm67_vm1, %v64_v4, %v66_v31 }
  0x1e   :  { %2210 = vmatprep.subr.bf16.mxu0 %v2209_v40  ;;  %v80_v27 = vmul.f32 %v1835_v12, %v70_v16  ;;  %v2255_v29 = vpack.c.bf16 %v178_v20, %v177_v19  ;;  %v2257_v30 = vpack.c.bf16 %v196_v26, %v195_v25  ;;  %v180_v33 = vld [vmem:[%s3065_s1 + $0x238] sm:$0xff]  ;;  %v197_v35 = vld [vmem:[%s3065_s1 + $0x2c0] sm:$0xff]  ;;  %v198_v36 = vld [vmem:[%s3065_s1 + $0x2c8] sm:$0xff]  ;;  %v87_v40 = vrot.slane %v2729_v57, 2 }
  0x1f   :  { %2240 = vmatpush3.bf16.msra.mxu1 %v2239_v39  ;;  %v85_v39 = vrot.slane %v2654_v21, 2  ;;  %v2259_v41 = vpack.c.bf16 %v180_v33, %v179_v32  ;;  %v68_v42 = vsel %vm67_vm1, %v63_v8, %v65_v37  ;;  %v2261_v43 = vpack.c.bf16 %v198_v36, %v197_v35  ;;  %v181_v31 = vld [vmem:[%s3065_s1 + $0x240] sm:$0xff]  ;;  %v182_v44 = vld [vmem:[%s3065_s1 + $0x248] sm:$0xff]  ;;  %v200_v46 = vld [vmem:[%s3065_s1 + $0x2d8] sm:$0xff] }
  0x20   :  { %2242 = vmatprep.subr.bf16.mxu1 %v2241_v45  ;;  %v199_v45 = vld [vmem:[%s3065_s1 + $0x2d0] sm:$0xff]  ;;  %v2263_v47 = vpack.c.bf16 %v182_v44, %v181_v31  ;;  %v184_v52 = vld [vmem:[%s3065_s1 + $0x258] sm:$0xff]  ;;  %v201_v53 = vld [vmem:[%s3065_s1 + $0x2e0] sm:$0xff]  ;;  %v89_v7 = vrot.slane %v2746_v63, 2  ;;  %v2875_v8 = vadd.s32 24, %v2574_v49  ;;  %v84_v10 = vrot.slane %v2649_v18, 2 }
  0x21   :  { %2212 = vmatpush3.bf16.msra.mxu0 %v2211_v51  ;;  %v98_v37 = vsel %vm92_vm3, %v85_v39, %v87_v40  ;;  %v2265_v48 = vpack.c.bf16 %v200_v46, %v199_v45  ;;  %v183_v51 = vld [vmem:[%s3065_s1 + $0x250] sm:$0xff]  ;;  %v185_v59 = vld [vmem:[%s3065_s1 + $0x260] sm:$0xff]  ;;  %v186_v60 = vld [vmem:[%s3065_s1 + $0x268] sm:$0xff]  ;;  %v88_v12 = vrot.slane %v2753_v1, 2 }
  0x22   :  { %2246 = vmatprep.subr.bf16.mxu0 %v2245_v55  ;;  %v2850_v55 = vadd.s32 8, %v2574_v49  ;;  %v2267_v56 = vpack.c.bf16 %v184_v52, %v183_v51  ;;  %v203_v61 = vld [vmem:[%s3065_s1 + $0x2f0] sm:$0xff]  ;;  %v2271_v3 = vpack.c.bf16 %v186_v60, %v185_v59  ;;  %v188_v6 = vld [vmem:[%s3065_s1 + $0x278] sm:$0xff]  ;;  %v543_v32 = vld [vmem:[%s3067_s2 + $0x8] sm:$0xff] }
  0x23   :  { %2244 = vmatpush3.bf16.msra.mxu1 %v2243_v54  ;;  %v202_v54 = vld [vmem:[%s3065_s1 + $0x2e8] sm:$0xff]  ;;  %v544_v21 = vld [vmem:[%s3067_s2 + $0x10] sm:$0xff]  ;;  %v1838_v36 = vld [vmem:[%s3068_s3] ss:$0 sm:$0xff] }
  0x24   :  { %274 = vmatmul.mubr.f32.vlgmr.msra.gmra.mrb[0].mxu0 %v76_v62  ;;  %v204_v62 = vld [vmem:[%s3065_s1 + $0x2f8] sm:$0xff]  ;;  %v923_v50 = vld [vmem:[%s3067_s2 + $0x40] sm:$0xff] }
  0x25   :  { %2248 = vmatpush3.bf16.msra.mxu0 %v2247_v2  ;;  %278 = vmatprep.mubr.f32.mxu0 %v73_v11  ;;  %v23_v2 = vand.u32 15, %v2850_v55  ;;  %v2273_v4 = vpack.c.bf16 %v204_v62, %v203_v61  ;;  %v86_v11 = vrot.slane %v2734_v58, 2 }
  0x26   :  { %359 = vmatmul.mubr.f32.vlgmr.msra.gmra.mrb[0].mxu1 %v2649_v18  ;;  %2250 = vmatprep.subr.bf16.mxu0 %v2249_v5  ;;  %v187_v5 = vld [vmem:[%s3065_s1 + $0x270] sm:$0xff] }
  0x27   :  { %363 = vmatprep.mubr.f32.mxu1 %v2729_v57  ;;  %v2269_v57 = vpack.c.bf16 %v202_v54, %v201_v53  ;;  %vm48_vm4 = vcmp.lt.s32.totalorder %v23_v2, 14  ;;  %v2275_v9 = vpack.c.bf16 %v188_v6, %v187_v5  ;;  %v95_v18 = vsel %vm92_vm3, %v86_v11, %v88_v12 }
  0x28   :  { %279 = vmatmul.mubr.f32.gmra.mrb[2].mxu0 %v72_v15  ;;  %v1836_v13 = vsel %vm48_vm4, 1.0, %v2446_v28  ;;  %v97_v15 = vsel %vm92_vm3, %v84_v10, %v86_v11  ;;  %vm514_vm10 = vcmp.lt.s32.totalorder %v23_v2, 12 }
  0x29   :  { %2252 = vmatpush3.bf16.msra.mxu0 %v2251_v14  ;;  %283 = vmatprep.mubr.f32.mxu0 %v81_v24  ;;  %v25_v14 = vand.u32 15, %v2875_v8  ;;  %v924_v8 = vld [vmem:[%s3067_s2 + $0x48] sm:$0xff] }
  0x2a   :  { %364 = vmatmul.mubr.f32.gmra.mrb[2].mxu1 %v2734_v58  ;;  %2254 = vmatprep.subr.bf16.mxu0 %v2253_v17  ;;  %v91_v58 = vrot.slane %v2664_v23, 2  ;;  %v90_v17 = vrot.slane %v2659_v22, 2 }
  0x2b   :  { %368 = vmatprep.mubr.f32.mxu1 %v2746_v63  ;;  %v96_v63 = vsel %vm92_vm3, %v87_v40, %v89_v7  ;;  %vm50_vm5 = vcmp.lt.s32.totalorder %v25_v14, 14  ;;  %vm516_vm15 = vcmp.lt.s32.totalorder %v25_v14, 12  ;;  %v2289_v14 = vpack.c.bf16 %v924_v8, %v923_v50 }
  0x2c   :  { %284 = vmatmul.mubr.f32.gmra.mrb[4].mxu0 %v80_v27  ;;  %v104_v16 = vmul.f32 %v1836_v13, %v96_v63  ;;  %v94_v19 = vsel %vm92_vm3, %v89_v7, %v91_v58  ;;  %v1837_v20 = vsel %vm50_vm5, 1.0, %v2446_v28  ;;  %v100_v24 = vsel %vm92_vm3, %v91_v58, %v85_v39  ;;  %v545_v27 = vld [vmem:[%s3067_s2 + $0x18] sm:$0xff] }
  0x2d   :  { %2256 = vmatpush3.bf16.msra.mxu0 %v2255_v29  ;;  %288 = vmatprep.mubr.f32.mxu0 %v69_v38  ;;  %v108_v25 = vmul.f32 %v1837_v20, %v100_v24  ;;  %v99_v26 = vsel %vm92_vm3, %v90_v17, %v84_v10  ;;  %v2277_v29 = vpack.c.bf16 %v545_v27, %v544_v21  ;;  %v1842_v34 = vsel %vm516_vm15, 1.0, %v2446_v28 }
  0x2e   :  { %369 = vmatmul.mubr.f32.gmra.mrb[4].mxu1 %v2753_v1  ;;  %2258 = vmatprep.subr.bf16.mxu0 %v2257_v30  ;;  %v103_v1 = vmul.f32 %v1836_v13, %v95_v18  ;;  %v542_v30 = vld [vmem:[%s3067_s2] sm:$0xff] }
  0x2f   :  { %373 = vmatprep.mubr.f32.mxu1 %v2664_v23  ;;  %v93_v23 = vsel %vm92_vm3, %v88_v12, %v90_v17  ;;  %2278 = vmatprep.subr.bf16.mxu1 %v2277_v29  ;;  %v2915_v33 = vpack.c.bf16 %v543_v32, %v542_v30 }
  0x30   :  { %289 = vmatmul.mubr.f32.gmra.mrb[6].mxu0 %v68_v42  ;;  %2280 = vmatpush3.bf16.msra.mxu1 %v2277_v29 }
  0x31   :  { %2260 = vmatpush3.bf16.msra.mxu0 %v2259_v41  ;;  %443 = vmatprep.mubr.f32.mxu0 %v98_v37 }
  0x32   :  { %374 = vmatmul.mubr.f32.gmra.mrb[6].mxu1 %v2659_v22  ;;  %2262 = vmatprep.subr.bf16.mxu0 %v2261_v43  ;;  %v107_v22 = vmul.f32 %v1837_v20, %v99_v26 }
  0x33   :  { %2282 = vmatprep.subr.bf16.mxu1 %v2915_v33 }
  0x35   :  { %2264 = vmatpush3.bf16.msra.mxu0 %v2263_v47 }
  0x36   :  { %2266 = vmatprep.subr.bf16.mxu0 %v2265_v48 }
  0x39   :  { %2268 = vmatpush3.bf16.msra.mxu0 %v2267_v56 }
  0x3a   :  { %2270 = vmatprep.subr.bf16.mxu0 %v2269_v57 }
  0x3d   :  { %2272 = vmatpush3.bf16.msra.mxu0 %v2271_v3 }
  0x3e   :  { %2274 = vmatprep.subr.bf16.mxu0 %v2273_v4 }
  0x41   :  { %2276 = vmatpush3.bf16.msra.mxu0 %v2275_v9 }
  0x44   :  { %444 = vmatmul.mubr.f32.vlgmr.msra.gmra.mrb[8].mxu0 %v97_v15 }
  0x45   :  { %448 = vmatprep.mubr.f32.mxu0 %v104_v16 }
  0x48   :  { %449 = vmatmul.mubr.f32.gmra.mrb[10].mxu0 %v103_v1 }
  0x49   :  { %453 = vmatprep.mubr.f32.mxu0 %v94_v19 }
  0x4c   :  { %454 = vmatmul.mubr.f32.gmra.mrb[12].mxu0 %v93_v23 }
  0x4d   :  { %458 = vmatprep.mubr.f32.mxu0 %v108_v25 }
  0x50   :  { %459 = vmatmul.mubr.f32.gmra.mrb[14].mxu0 %v107_v22 }
  0xf7   :  { %v1921_v35 = vpop.f32.mrb[0].mxu0 }
  0xf8   :  { %v1922_v38 = vpop.f32.mrb[1].mxu0 }
  0xf9   :  { %v1965_v39 = vpop.f32.mrb[0].mxu1  ;;  %v1923_v40 = vadd.f32 %v1922_v38, %v1921_v35 }
  0xfa   :  { %v1966_v41 = vpop.f32.mrb[1].mxu1 }
  0xfb   :  { %v1967_v42 = vadd.f32 %v1966_v41, %v1965_v39  ;;  %v276_v43 = vadd.f32 %v1923_v40, %v1838_v36  ;;  %v1924_v31 = vpop.f32.mrb[2].mxu0 }
  0xfc   :  { %v1925_v44 = vpop.f32.mrb[3].mxu0 }
  0xfd   :  { %v1968_v45 = vpop.f32.mrb[2].mxu1  ;;  %v361_v46 = vadd.f32 %v1967_v42, %v276_v43  ;;  %v1926_v37 = vadd.f32 %v1925_v44, %v1924_v31 }
  0xfe   :  { %v1969_v47 = vpop.f32.mrb[3].mxu1 }
  0xff   :  { %v1970_v48 = vadd.f32 %v1969_v47, %v1968_v45  ;;  %v281_v51 = vadd.f32 %v1926_v37, %v1838_v36  ;;  %v1927_v52 = vpop.f32.mrb[4].mxu0 }
 0x100   :  { %v1928_v53 = vpop.f32.mrb[5].mxu0 }
 0x101   :  { %v1971_v54 = vpop.f32.mrb[4].mxu1  ;;  %v366_v56 = vadd.f32 %v1970_v48, %v281_v51  ;;  %v1929_v57 = vadd.f32 %v1928_v53, %v1927_v52  ;;  %v741_v52 = vld [vmem:[%s3067_s2 + $0x20] sm:$0xff]  ;;  %v742_v53 = vld [vmem:[%s3067_s2 + $0x28] sm:$0xff] }
 0x102   :  { %v1972_v59 = vpop.f32.mrb[5].mxu1 }
 0x103   :  { %v1973_v60 = vadd.f32 %v1972_v59, %v1971_v54  ;;  %v286_v61 = vadd.f32 %v1929_v57, %v1838_v36  ;;  %v1930_v62 = vpop.f32.mrb[6].mxu0  ;;  %v2285_v57 = vpack.c.bf16 %v742_v53, %v741_v52 }
 0x104   :  { %v1931_v3 = vpop.f32.mrb[7].mxu0 }
 0x105   :  { %v1974_v4 = vpop.f32.mrb[6].mxu1  ;;  %v371_v5 = vadd.f32 %v1973_v60, %v286_v61  ;;  %v1932_v6 = vadd.f32 %v1931_v3, %v1930_v62 }
 0x106   :  { %v1975_v7 = vpop.f32.mrb[7].mxu1 }
 0x107   :  { %v1976_v9 = vadd.f32 %v1975_v7, %v1974_v4  ;;  %v291_v10 = vadd.f32 %v1932_v6, %v1838_v36 }
 0x109   :  { %v376_v11 = vadd.f32 %v1976_v9, %v291_v10 }
 0x117   :  { %v2009_v12 = vpop.f32.mrb[8].mxu0 }
 0x118   :  { %v2010_v13 = vpop.f32.mrb[9].mxu0 }
 0x119   :  { %v2011_v63 = vadd.f32 %v2010_v13, %v2009_v12  ;;  %v1839_v13 = vsel %vm501_vm12, 1.0, %v2446_v28 }
 0x11b   :  { %v446_v15 = vadd.f32 %v2011_v63, %v361_v46  ;;  %v2012_v16 = vpop.f32.mrb[10].mxu0 }
 0x11c   :  { %v2013_v18 = vpop.f32.mrb[11].mxu0 }
 0x11d   :  { %v468_v58 = vmin.f32 %v446_v15, 0.0  ;;  %v2014_v1 = vadd.f32 %v2013_v18, %v2012_v16  ;;  %vm464_vm7 = vcmp.gt.f32.partialorder %v446_v15, 0.0 }
 0x11f   :  { %v472_v17 = vmul.f32 0.5, %v468_v58  ;;  %v451_v19 = vadd.f32 %v2014_v1, %v366_v56  ;;  %v2015_v20 = vpop.f32.mrb[12].mxu0  ;;  %v922_v1 = vld [vmem:[%s3067_s2 + $0x38] sm:$0xff] }
 0x120   :  { %v2016_v24 = vpop.f32.mrb[13].mxu0 }
 0x121   :  { %2334 = vtanh.f32 %v472_v17  ;;  %v469_v23 = vmin.f32 %v451_v19, 0.0  ;;  %v2017_v25 = vadd.f32 %v2016_v24, %v2015_v20  ;;  %vm465_vm8 = vcmp.gt.f32.partialorder %v451_v19, 0.0 }
 0x123   :  { %v473_v26 = vmul.f32 0.5, %v469_v23  ;;  %v456_v22 = vadd.f32 %v2017_v25, %v371_v5  ;;  %v2018_v21 = vpop.f32.mrb[14].mxu0 }
 0x124   :  { %v2019_v27 = vpop.f32.mrb[15].mxu0 }
 0x125   :  { %2336 = vtanh.f32 %v473_v26  ;;  %v470_v29 = vmin.f32 %v456_v22, 0.0  ;;  %v2020_v30 = vadd.f32 %v2019_v27, %v2018_v21  ;;  %vm466_vm11 = vcmp.gt.f32.partialorder %v456_v22, 0.0 }
 0x127   :  { %v474_v32 = vmul.f32 0.5, %v470_v29  ;;  %v461_v35 = vadd.f32 %v2020_v30, %v376_v11  ;;  %v1841_v11 = vsel %vm514_vm10, 1.0, %v2446_v28  ;;  %v921_v28 = vld [vmem:[%s3067_s2 + $0x30] sm:$0xff] }
 0x128   :  { %v2293_v17 = vpack.c.bf16 %v922_v1, %v921_v28 }
 0x129   :  { %2338 = vtanh.f32 %v474_v32  ;;  %v471_v36 = vmin.f32 %v461_v35, 0.0  ;;  %vm467_vm13 = vcmp.gt.f32.partialorder %v461_v35, 0.0 }
 0x12b   :  { %v2335_v38 = vpop.eup %2334  ;;  %v475_v39 = vmul.f32 0.5, %v471_v36 }
 0x12c   :  { %v484_v40 = vsub.f32 1.0, %v2335_v38  ;;  %v480_v45 = vmul.f32 2.0, %v2335_v38 }
 0x12d   :  { %2340 = vtanh.f32 %v475_v39 }
 0x12e   :  { %2342 = vrcp.f32 %v484_v40 }
 0x12f   :  { %v2337_v41 = vpop.eup %2336 }
 0x130   :  { %v485_v42 = vsub.f32 1.0, %v2337_v41  ;;  %v481_v48 = vmul.f32 2.0, %v2337_v41 }
 0x132   :  { %2344 = vrcp.f32 %v485_v42 }
 0x133   :  { %v2339_v43 = vpop.eup %2338 }
 0x134   :  { %v486_v31 = vsub.f32 1.0, %v2339_v43  ;;  %v482_v60 = vmul.f32 2.0, %v2339_v43 }
 0x136   :  { %2346 = vrcp.f32 %v486_v31 }
 0x137   :  { %v2341_v44 = vpop.eup %2340 }
 0x138   :  { %v2343_v46 = vpop.eup %2342  ;;  %v487_v37 = vsub.f32 1.0, %v2341_v44  ;;  %v483_v7 = vmul.f32 2.0, %v2341_v44 }
 0x139   :  { %v489_v47 = vmul.f32 %v2343_v46, %v480_v45 }
 0x13a   :  { %2348 = vrcp.f32 %v487_v37 }
 0x13b   :  { %v496_v51 = vsel %vm464_vm7, %v446_v15, %v489_v47 }
 0x13c   :  { %v2345_v54 = vpop.eup %2344  ;;  %2085 = vmatprep.mubr.msk.f32.mxu1 %vm546_vm6, %v496_v51  ;;  %v525_v3 = vrot.slane %v496_v51, 4 }
 0x13d   :  { %v491_v56 = vmul.f32 %v2345_v54, %v481_v48  ;;  %v1119_v54 = vld [vmem:[%s3067_s2 + $0x50] sm:$0xff] }
 0x13f   :  { %v497_v59 = vsel %vm465_vm8, %v451_v19, %v491_v56  ;;  %v1855_v19 = vld [vmem:[%s3068_s3 + $0x1] ss:$0 sm:$0xff]  ;;  %v1120_v56 = vld [vmem:[%s3067_s2 + $0x58] sm:$0xff] }
 0x140   :  { %v2347_v61 = vpop.eup %2346  ;;  %v526_v62 = vrot.slane %v497_v59, 4  ;;  %2086 = vmatmul.mubr.msk.f32.vlgmr.msra.gmra.mrb[8].mxu1 %vm546_vm6, %v497_v59 }
 0x141   :  { %v493_v4 = vmul.f32 %v2347_v61, %v482_v60  ;;  %2284 = vmatpush3.bf16.msra.mxu1 %v2915_v33 }
 0x142   :  { %2286 = vmatprep.subr.bf16.mxu1 %v2285_v57  ;;  %v532_v5 = vsel %vm529_vm9, %v525_v3, %v526_v62 }
 0x143   :  { %v498_v6 = vsel %vm466_vm11, %v456_v22, %v493_v4 }
 0x144   :  { %v2349_v9 = vpop.eup %2348  ;;  %v527_v10 = vrot.slane %v498_v6, 4  ;;  %2088 = vmatprep.mubr.msk.f32.mxu1 %vm546_vm6, %v498_v6 }
 0x145   :  { %v495_v55 = vmul.f32 %v2349_v9, %v483_v7 }
 0x146   :  { %v531_v2 = vsel %vm529_vm9, %v526_v62, %v527_v10 }
 0x147   :  { %v499_v33 = vsel %vm467_vm13, %v461_v35, %v495_v55  ;;  %v539_v12 = vmul.f32 %v1841_v11, %v531_v2  ;;  %v536_v58 = vmul.f32 %v1840_v0, %v531_v2 }
 0x148   :  { %v528_v63 = vrot.slane %v499_v33, 4  ;;  %2089 = vmatmul.mubr.msk.f32.gmra.mrb[10].mxu1 %vm546_vm6, %v499_v33 }
 0x14a   :  { %v533_v15 = vsel %vm529_vm9, %v528_v63, %v525_v3  ;;  %v530_v16 = vsel %vm529_vm9, %v527_v10, %v528_v63  ;;  %v2297_v3 = vpack.c.bf16 %v1120_v56, %v1119_v54  ;;  %v1869_v56 = vld [vmem:[%s3068_s3 + $0x3] ss:$0 sm:$0xff] }
 0x14b   :  { %v534_v18 = vmul.f32 %v1839_v13, %v533_v15  ;;  %v541_v49 = vmul.f32 %v1842_v34, %v533_v15  ;;  %v1268_v13 = vld [vmem:[%s3067_s2 + $0x78] sm:$0xff]  ;;  %v1868_v15 = vld [vmem:[%s3068_s3 + $0x2] ss:$0 sm:$0xff] }
 0x14d   :  { %2095 = vmatprep.mubr.msk.f32.mxu1 %vm546_vm6, %v534_v18 }
 0x14e   :  { %2096 = vmatmul.mubr.msk.f32.vlgmr.msra.gmra.mrb[8].mxu1 %vm546_vm6, %v532_v5 }
 0x14f   :  { %2288 = vmatpush3.bf16.msra.mxu1 %v2285_v57  ;;  %2098 = vmatprep.mubr.msk.f32.mxu1 %vm546_vm6, %v536_v58 }
 0x150   :  { %2290 = vmatprep.subr.bf16.mxu1 %v2289_v14 }
 0x152   :  { %2099 = vmatmul.mubr.msk.f32.gmra.mrb[10].mxu1 %vm546_vm6, %v530_v16 }
 0x153   :  { %2105 = vmatprep.mubr.msk.f32.mxu1 %vm546_vm6, %v532_v5 }
 0x156   :  { %2106 = vmatmul.mubr.msk.f32.vlgmr.msra.gmra.mrb[8].mxu1 %vm546_vm6, %v539_v12  ;;  %v1267_v12 = vld [vmem:[%s3067_s2 + $0x70] sm:$0xff] }
 0x157   :  { %2108 = vmatprep.mubr.msk.f32.mxu1 %vm546_vm6, %v530_v16  ;;  %2292 = vmatpush3.bf16.msra.mxu1 %v2289_v14  ;;  %v2301_v63 = vpack.c.bf16 %v1268_v13, %v1267_v12 }
 0x158   :  { %2294 = vmatprep.subr.bf16.mxu1 %v2293_v17 }
 0x159   :  { %2302 = vmatprep.subr.bf16.mxu0 %v2301_v63 }
 0x15a   :  { %2109 = vmatmul.mubr.msk.f32.gmra.mrb[10].mxu1 %vm546_vm6, %v541_v49  ;;  %2304 = vmatpush3.bf16.msra.mxu0 %v2301_v63 }
 0x229   :  { %v2107_v20 = vpop.f32.mrb[8].mxu1 }
 0x22a   :  { %v849_v24 = vadd.f32 %v2107_v20, %v1855_v19  ;;  %v821_v23 = vpop.f32.mrb[9].mxu1 }
 0x22b   :  { %v848_v25 = vadd.f32 %v1855_v19, %v821_v23 }
 0x22c   :  { %v857_v26 = vmin.f32 %v849_v24, 0.0  ;;  %vm853_vm1 = vcmp.gt.f32.partialorder %v849_v24, 0.0 }
 0x22d   :  { %v856_v22 = vmin.f32 %v848_v25, 0.0  ;;  %v2110_v21 = vpop.f32.mrb[10].mxu1  ;;  %vm852_vm0 = vcmp.gt.f32.partialorder %v848_v25, 0.0 }
 0x22e   :  { %v861_v27 = vmul.f32 0.5, %v857_v26  ;;  %v851_v29 = vadd.f32 %v2110_v21, %v1855_v19  ;;  %v831_v30 = vpop.f32.mrb[11].mxu1 }
 0x22f   :  { %v860_v32 = vmul.f32 0.5, %v856_v22  ;;  %v850_v35 = vadd.f32 %v1855_v19, %v831_v30 }
 0x230   :  { %2350 = vtanh.f32 %v861_v27  ;;  %v859_v36 = vmin.f32 %v851_v29, 0.0  ;;  %vm855_vm2 = vcmp.gt.f32.partialorder %v851_v29, 0.0 }
 0x231   :  { %2352 = vtanh.f32 %v860_v32  ;;  %v858_v38 = vmin.f32 %v850_v35, 0.0  ;;  %vm854_vm3 = vcmp.gt.f32.partialorder %v850_v35, 0.0 }
 0x232   :  { %v863_v39 = vmul.f32 0.5, %v859_v36 }
 0x233   :  { %v862_v40 = vmul.f32 0.5, %v858_v38 }
 0x234   :  { %2354 = vtanh.f32 %v863_v39 }
 0x235   :  { %2356 = vtanh.f32 %v862_v40 }
 0x23a   :  { %v2351_v41 = vpop.eup %2350 }
 0x23b   :  { %v2353_v42 = vpop.eup %2352  ;;  %v873_v43 = vsub.f32 1.0, %v2351_v41  ;;  %v869_v47 = vmul.f32 2.0, %v2351_v41 }
 0x23c   :  { %v872_v31 = vsub.f32 1.0, %v2353_v42  ;;  %v868_v51 = vmul.f32 2.0, %v2353_v42 }
 0x23d   :  { %2358 = vrcp.f32 %v873_v43 }
 0x23e   :  { %v2355_v44 = vpop.eup %2354  ;;  %2360 = vrcp.f32 %v872_v31 }
 0x23f   :  { %v2357_v45 = vpop.eup %2356  ;;  %v875_v46 = vsub.f32 1.0, %v2355_v44  ;;  %v871_v59 = vmul.f32 2.0, %v2355_v44 }
 0x240   :  { %v874_v37 = vsub.f32 1.0, %v2357_v45  ;;  %v870_v62 = vmul.f32 2.0, %v2357_v45 }
 0x241   :  { %2362 = vrcp.f32 %v875_v46 }
 0x242   :  { %2364 = vrcp.f32 %v874_v37 }
 0x247   :  { %v2359_v48 = vpop.eup %2358 }
 0x248   :  { %v2361_v52 = vpop.eup %2360  ;;  %v879_v53 = vmul.f32 %v2359_v48, %v869_v47 }
 0x249   :  { %v877_v57 = vmul.f32 %v2361_v52, %v868_v51  ;;  %v1407_v52 = vld [vmem:[%s3067_s2 + $0xa0] sm:$0xff] }
 0x24a   :  { %v885_v5 = vsel %vm853_vm1, %v849_v24, %v879_v53  ;;  %v1408_v53 = vld [vmem:[%s3067_s2 + $0xa8] sm:$0xff] }
 0x24b   :  { %v2363_v60 = vpop.eup %2362  ;;  %v884_v61 = vsel %vm852_vm0, %v848_v25, %v877_v57  ;;  %v915_v55 = vmul.f32 0.0, %v885_v5  ;;  %v2305_v54 = vpack.c.bf16 %v1408_v53, %v1407_v52 }
 0x24c   :  { %v2365_v4 = vpop.eup %2364  ;;  %2115 = vmatprep.mubr.msk.f32.mxu1 %vm546_vm6, %v884_v61  ;;  %v883_v6 = vmul.f32 %v2363_v60, %v871_v59  ;;  %v920_v33 = vmul.f32 0.0, %v884_v61 }
 0x24d   :  { %2116 = vmatmul.mubr.msk.f32.vlgmr.msra.gmra.mrb[12].mxu1 %vm546_vm6, %v885_v5  ;;  %v881_v7 = vmul.f32 %v2365_v4, %v870_v62  ;;  %2306 = vmatprep.subr.bf16.mxu0 %v2305_v54 }
 0x24e   :  { %2296 = vmatpush3.bf16.msra.mxu1 %v2293_v17  ;;  %v887_v9 = vsel %vm855_vm2, %v851_v29, %v883_v6 }
 0x24f   :  { %v886_v10 = vsel %vm854_vm3, %v850_v35, %v881_v7  ;;  %v913_v11 = vmul.f32 0.0, %v887_v9  ;;  %2298 = vmatprep.subr.bf16.mxu1 %v2297_v3 }
 0x250   :  { %2118 = vmatprep.mubr.msk.f32.mxu1 %vm546_vm6, %v886_v10  ;;  %v918_v2 = vmul.f32 0.0, %v886_v10 }
 0x251   :  { %2119 = vmatmul.mubr.msk.f32.gmra.mrb[14].mxu1 %vm546_vm6, %v887_v9 }
 0x252   :  { %2125 = vmatprep.mubr.msk.f32.mxu1 %vm546_vm6, %v913_v11 }
 0x255   :  { %2126 = vmatmul.mubr.msk.f32.vlgmr.msra.gmra.mrb[12].mxu1 %vm546_vm6, %v884_v61 }
 0x256   :  { %2300 = vmatpush3.bf16.msra.mxu1 %v2297_v3  ;;  %2128 = vmatprep.mubr.msk.f32.mxu1 %vm546_vm6, %v915_v55 }
 0x259   :  { %2129 = vmatmul.mubr.msk.f32.gmra.mrb[14].mxu1 %vm546_vm6, %v886_v10 }
 0x25a   :  { %2135 = vmatprep.mubr.msk.f32.mxu1 %vm546_vm6, %v885_v5 }
 0x25d   :  { %2136 = vmatmul.mubr.msk.f32.vlgmr.msra.gmra.mrb[12].mxu1 %vm546_vm6, %v918_v2 }
 0x25e   :  { %2138 = vmatprep.mubr.msk.f32.mxu1 %vm546_vm6, %v887_v9 }
 0x261   :  { %2139 = vmatmul.mubr.msk.f32.gmra.mrb[14].mxu1 %vm546_vm6, %v920_v33 }
 0x330   :  { %v2137_v0 = vpop.f32.mrb[12].mxu1 }
 0x331   :  { %v1227_v16 = vadd.f32 %v2137_v0, %v1868_v15  ;;  %v1199_v18 = vpop.f32.mrb[13].mxu1 }
 0x332   :  { %v1226_v58 = vadd.f32 %v1868_v15, %v1199_v18 }
 0x333   :  { %v1235_v34 = vmin.f32 %v1227_v16, 0.0  ;;  %vm1231_vm5 = vcmp.gt.f32.partialorder %v1227_v16, 0.0 }
 0x334   :  { %v1234_v49 = vmin.f32 %v1226_v58, 0.0  ;;  %v2140_v50 = vpop.f32.mrb[14].mxu1  ;;  %vm1230_vm4 = vcmp.gt.f32.partialorder %v1226_v58, 0.0 }
 0x335   :  { %v1239_v8 = vmul.f32 0.5, %v1235_v34  ;;  %v1229_v14 = vadd.f32 %v2140_v50, %v1868_v15  ;;  %v1209_v28 = vpop.f32.mrb[15].mxu1 }
 0x336   :  { %v1238_v1 = vmul.f32 0.5, %v1234_v49  ;;  %v1228_v17 = vadd.f32 %v1868_v15, %v1209_v28 }
 0x337   :  { %2366 = vtanh.f32 %v1239_v8  ;;  %v1237_v19 = vmin.f32 %v1229_v14, 0.0  ;;  %vm1233_vm8 = vcmp.gt.f32.partialorder %v1229_v14, 0.0 }
 0x338   :  { %2368 = vtanh.f32 %v1238_v1  ;;  %v1236_v20 = vmin.f32 %v1228_v17, 0.0  ;;  %vm1232_vm7 = vcmp.gt.f32.partialorder %v1228_v17, 0.0 }
 0x339   :  { %v1241_v24 = vmul.f32 0.5, %v1237_v19 }
 0x33a   :  { %v1240_v23 = vmul.f32 0.5, %v1236_v20 }
 0x33b   :  { %2370 = vtanh.f32 %v1241_v24 }
 0x33c   :  { %2372 = vtanh.f32 %v1240_v23 }
 0x341   :  { %v2367_v25 = vpop.eup %2366 }
 0x342   :  { %v2369_v26 = vpop.eup %2368  ;;  %v1251_v22 = vsub.f32 1.0, %v2367_v25  ;;  %v1247_v35 = vmul.f32 2.0, %v2367_v25 }
 0x343   :  { %v1250_v21 = vsub.f32 1.0, %v2369_v26  ;;  %v1246_v38 = vmul.f32 2.0, %v2369_v26 }
 0x344   :  { %2374 = vrcp.f32 %v1251_v22 }
 0x345   :  { %v2371_v27 = vpop.eup %2370  ;;  %2376 = vrcp.f32 %v1250_v21 }
 0x346   :  { %v2373_v29 = vpop.eup %2372  ;;  %v1253_v30 = vsub.f32 1.0, %v2371_v27  ;;  %v1249_v42 = vmul.f32 2.0, %v2371_v27  ;;  %v1547_v27 = vld [vmem:[%s3067_s2 + $0xd0] sm:$0xff] }
 0x347   :  { %v1252_v32 = vsub.f32 1.0, %v2373_v29  ;;  %v1248_v44 = vmul.f32 2.0, %v2373_v29  ;;  %v1548_v29 = vld [vmem:[%s3067_s2 + $0xd8] sm:$0xff] }
 0x348   :  { %2378 = vrcp.f32 %v1253_v30  ;;  %v2309_v30 = vpack.c.bf16 %v1548_v29, %v1547_v27 }
 0x349   :  { %2380 = vrcp.f32 %v1252_v32  ;;  %v1874_v32 = vld [vmem:[%s3068_s3 + $0x4] ss:$0 sm:$0xff] }
 0x34e   :  { %v2375_v36 = vpop.eup %2374 }
 0x34f   :  { %v2377_v39 = vpop.eup %2376  ;;  %v1257_v40 = vmul.f32 %v2375_v36, %v1247_v35 }
 0x350   :  { %v1255_v41 = vmul.f32 %v2377_v39, %v1246_v38 }
 0x351   :  { %v1263_v46 = vsel %vm1231_vm5, %v1227_v16, %v1257_v40 }
 0x352   :  { %v2379_v43 = vpop.eup %2378  ;;  %v1262_v31 = vsel %vm1230_vm4, %v1226_v58, %v1255_v41 }
 0x353   :  { %v2381_v45 = vpop.eup %2380  ;;  %2145 = vmatprep.mubr.msk.f32.mxu0 %vm546_vm6, %v1262_v31  ;;  %v1261_v37 = vmul.f32 %v2379_v43, %v1249_v42 }
 0x354   :  { %2146 = vmatmul.mubr.msk.f32.vlgmr.msra.gmra.mrb[16].mxu0 %vm546_vm6, %v1263_v46  ;;  %v1259_v47 = vmul.f32 %v2381_v45, %v1248_v44 }
 0x355   :  { %v1265_v51 = vsel %vm1233_vm8, %v1229_v14, %v1261_v37  ;;  %2308 = vmatpush3.bf16.msra.mxu0 %v2305_v54 }
 0x356   :  { %v1264_v48 = vsel %vm1232_vm7, %v1228_v17, %v1259_v47  ;;  %2310 = vmatprep.subr.bf16.mxu0 %v2309_v30 }
 0x357   :  { %2148 = vmatprep.mubr.msk.f32.mxu0 %vm546_vm6, %v1264_v48 }
 0x358   :  { %2149 = vmatmul.mubr.msk.f32.gmra.mrb[18].mxu0 %vm546_vm6, %v1265_v51 }
 0x427   :  { %v2147_v57 = vpop.f32.mrb[16].mxu0 }
 0x428   :  { %v1357_v59 = vadd.f32 %v2147_v57, %v1869_v56  ;;  %v1351_v60 = vpop.f32.mrb[17].mxu0 }
 0x429   :  { %v1352_v61 = vadd.f32 %v1869_v56, %v1351_v60 }
 0x42a   :  { %v1375_v62 = vmin.f32 %v1357_v59, 0.0  ;;  %vm1371_vm10 = vcmp.gt.f32.partialorder %v1357_v59, 0.0 }
 0x42b   :  { %v1374_v3 = vmin.f32 %v1352_v61, 0.0  ;;  %v2150_v4 = vpop.f32.mrb[18].mxu0  ;;  %vm1370_vm9 = vcmp.gt.f32.partialorder %v1352_v61, 0.0 }
 0x42c   :  { %v1379_v5 = vmul.f32 0.5, %v1375_v62  ;;  %v1367_v6 = vadd.f32 %v2150_v4, %v1869_v56  ;;  %v1361_v7 = vpop.f32.mrb[19].mxu0 }
 0x42d   :  { %v1378_v9 = vmul.f32 0.5, %v1374_v3  ;;  %v1362_v10 = vadd.f32 %v1869_v56, %v1361_v7 }
 0x42e   :  { %2382 = vtanh.f32 %v1379_v5  ;;  %v1377_v11 = vmin.f32 %v1367_v6, 0.0  ;;  %vm1373_vm12 = vcmp.gt.f32.partialorder %v1367_v6, 0.0 }
 0x42f   :  { %2384 = vtanh.f32 %v1378_v9  ;;  %v1376_v55 = vmin.f32 %v1362_v10, 0.0  ;;  %vm1372_vm11 = vcmp.gt.f32.partialorder %v1362_v10, 0.0 }
 0x430   :  { %v1381_v2 = vmul.f32 0.5, %v1377_v11 }
 0x431   :  { %v1380_v33 = vmul.f32 0.5, %v1376_v55 }
 0x432   :  { %2386 = vtanh.f32 %v1381_v2 }
 0x433   :  { %2388 = vtanh.f32 %v1380_v33 }
 0x438   :  { %v2383_v12 = vpop.eup %2382 }
 0x439   :  { %v2385_v13 = vpop.eup %2384  ;;  %v1391_v63 = vsub.f32 1.0, %v2383_v12  ;;  %v1387_v34 = vmul.f32 2.0, %v2383_v12 }
 0x43a   :  { %v1390_v15 = vsub.f32 1.0, %v2385_v13  ;;  %v1386_v50 = vmul.f32 2.0, %v2385_v13 }
 0x43b   :  { %2390 = vrcp.f32 %v1391_v63 }
 0x43c   :  { %v2387_v0 = vpop.eup %2386  ;;  %2392 = vrcp.f32 %v1390_v15 }
 0x43d   :  { %v2389_v16 = vpop.eup %2388  ;;  %v1393_v18 = vsub.f32 1.0, %v2387_v0  ;;  %v1389_v1 = vmul.f32 2.0, %v2387_v0  ;;  %v1687_v0 = vld [vmem:[%s3067_s2 + $0x100] sm:$0xff] }
 0x43e   :  { %v1392_v58 = vsub.f32 1.0, %v2389_v16  ;;  %v1388_v20 = vmul.f32 2.0, %v2389_v16  ;;  %v1688_v16 = vld [vmem:[%s3067_s2 + $0x108] sm:$0xff] }
 0x43f   :  { %2394 = vrcp.f32 %v1393_v18  ;;  %v2313_v18 = vpack.c.bf16 %v1688_v16, %v1687_v0 }
 0x440   :  { %2396 = vrcp.f32 %v1392_v58  ;;  %v1879_v58 = vld [vmem:[%s3068_s3 + $0x5] ss:$0 sm:$0xff] }
 0x441   :  { %2314 = vmatprep.subr.bf16.mxu1 %v2313_v18 }
 0x442   :  { %2316 = vmatpush3.bf16.msra.mxu1 %v2313_v18 }
 0x445   :  { %v2391_v49 = vpop.eup %2390 }
 0x446   :  { %v2393_v8 = vpop.eup %2392  ;;  %v1397_v14 = vmul.f32 %v2391_v49, %v1387_v34 }
 0x447   :  { %v1395_v28 = vmul.f32 %v2393_v8, %v1386_v50 }
 0x448   :  { %v1403_v23 = vsel %vm1371_vm10, %v1357_v59, %v1397_v14 }
 0x449   :  { %v2395_v17 = vpop.eup %2394  ;;  %v1402_v19 = vsel %vm1370_vm9, %v1352_v61, %v1395_v28 }
 0x44a   :  { %v2397_v24 = vpop.eup %2396  ;;  %2155 = vmatprep.mubr.msk.f32.mxu0 %vm546_vm6, %v1402_v19  ;;  %v1401_v25 = vmul.f32 %v2395_v17, %v1389_v1 }
 0x44b   :  { %2156 = vmatmul.mubr.msk.f32.vlgmr.msra.gmra.mrb[20].mxu0 %vm546_vm6, %v1403_v23  ;;  %v1399_v26 = vmul.f32 %v2397_v24, %v1388_v20 }
 0x44c   :  { %v1405_v21 = vsel %vm1373_vm12, %v1367_v6, %v1401_v25  ;;  %2312 = vmatpush3.bf16.msra.mxu0 %v2309_v30 }
 0x44d   :  { %v1404_v22 = vsel %vm1372_vm11, %v1362_v10, %v1399_v26 }
 0x44e   :  { %2158 = vmatprep.mubr.msk.f32.mxu0 %vm546_vm6, %v1404_v22 }
 0x44f   :  { %2159 = vmatmul.mubr.msk.f32.gmra.mrb[22].mxu0 %vm546_vm6, %v1405_v21 }
 0x51e   :  { %v2157_v35 = vpop.f32.mrb[20].mxu0 }
 0x51f   :  { %v1497_v36 = vadd.f32 %v2157_v35, %v1874_v32  ;;  %v1491_v38 = vpop.f32.mrb[21].mxu0 }
 0x520   :  { %v1492_v39 = vadd.f32 %v1874_v32, %v1491_v38 }
 0x521   :  { %v1515_v40 = vmin.f32 %v1497_v36, 0.0  ;;  %vm1511_vm14 = vcmp.gt.f32.partialorder %v1497_v36, 0.0 }
 0x522   :  { %v1514_v41 = vmin.f32 %v1492_v39, 0.0  ;;  %v2160_v42 = vpop.f32.mrb[22].mxu0  ;;  %vm1510_vm13 = vcmp.gt.f32.partialorder %v1492_v39, 0.0 }
 0x523   :  { %v1519_v43 = vmul.f32 0.5, %v1515_v40  ;;  %v1507_v31 = vadd.f32 %v2160_v42, %v1874_v32  ;;  %v1501_v44 = vpop.f32.mrb[23].mxu0 }
 0x524   :  { %v1518_v45 = vmul.f32 0.5, %v1514_v41  ;;  %v1502_v46 = vadd.f32 %v1874_v32, %v1501_v44 }
 0x525   :  { %2398 = vtanh.f32 %v1519_v43  ;;  %v1517_v37 = vmin.f32 %v1507_v31, 0.0  ;;  %vm1513_vm0 = vcmp.gt.f32.partialorder %v1507_v31, 0.0 }
 0x526   :  { %2400 = vtanh.f32 %v1518_v45  ;;  %v1516_v47 = vmin.f32 %v1502_v46, 0.0  ;;  %vm1512_vm15 = vcmp.gt.f32.partialorder %v1502_v46, 0.0 }
 0x527   :  { %v1521_v48 = vmul.f32 0.5, %v1517_v37 }
 0x528   :  { %v1520_v51 = vmul.f32 0.5, %v1516_v47 }
 0x529   :  { %2402 = vtanh.f32 %v1521_v48 }
 0x52a   :  { %2404 = vtanh.f32 %v1520_v51 }
 0x52f   :  { %v2399_v52 = vpop.eup %2398 }
 0x530   :  { %v2401_v53 = vpop.eup %2400  ;;  %v1531_v54 = vsub.f32 1.0, %v2399_v52  ;;  %v1527_v62 = vmul.f32 2.0, %v2399_v52 }
 0x531   :  { %v1530_v56 = vsub.f32 1.0, %v2401_v53  ;;  %v1526_v4 = vmul.f32 2.0, %v2401_v53 }
 0x532   :  { %2406 = vrcp.f32 %v1531_v54 }
 0x533   :  { %v2403_v57 = vpop.eup %2402  ;;  %2408 = vrcp.f32 %v1530_v56 }
 0x534   :  { %v2405_v59 = vpop.eup %2404  ;;  %v1533_v60 = vsub.f32 1.0, %v2403_v57  ;;  %v1529_v9 = vmul.f32 2.0, %v2403_v57  ;;  %v1884_v57 = vld [vmem:[%s3068_s3 + $0x6] ss:$0 sm:$0xff] }
 0x535   :  { %v1532_v61 = vsub.f32 1.0, %v2405_v59  ;;  %v1528_v55 = vmul.f32 2.0, %v2405_v59 }
 0x536   :  { %2410 = vrcp.f32 %v1533_v60 }
 0x537   :  { %2412 = vrcp.f32 %v1532_v61 }
 0x53c   :  { %v2407_v3 = vpop.eup %2406 }
 0x53d   :  { %v2409_v5 = vpop.eup %2408  ;;  %v1537_v6 = vmul.f32 %v2407_v3, %v1527_v62 }
 0x53e   :  { %v1535_v7 = vmul.f32 %v2409_v5, %v1526_v4 }
 0x53f   :  { %v1543_v33 = vsel %vm1511_vm14, %v1497_v36, %v1537_v6 }
 0x540   :  { %v2411_v10 = vpop.eup %2410  ;;  %v1542_v11 = vsel %vm1510_vm13, %v1492_v39, %v1535_v7 }
 0x541   :  { %v2413_v2 = vpop.eup %2412  ;;  %2165 = vmatprep.mubr.msk.f32.mxu0 %vm546_vm6, %v1542_v11  ;;  %v1541_v12 = vmul.f32 %v2411_v10, %v1529_v9 }
 0x542   :  { %2166 = vmatmul.mubr.msk.f32.vlgmr.msra.gmra.mrb[24].mxu0 %vm546_vm6, %v1543_v33  ;;  %v1539_v13 = vmul.f32 %v2413_v2, %v1528_v55 }
 0x543   :  { %v1545_v15 = vsel %vm1513_vm0, %v1507_v31, %v1541_v12 }
 0x544   :  { %v1544_v63 = vsel %vm1512_vm15, %v1502_v46, %v1539_v13 }
 0x545   :  { %2168 = vmatprep.mubr.msk.f32.mxu0 %vm546_vm6, %v1544_v63 }
 0x546   :  { %2169 = vmatmul.mubr.msk.f32.gmra.mrb[26].mxu0 %vm546_vm6, %v1545_v15 }
 0x615   :  { %v2167_v34 = vpop.f32.mrb[24].mxu0 }
 0x616   :  { %v1637_v49 = vadd.f32 %v2167_v34, %v1879_v58  ;;  %v1631_v50 = vpop.f32.mrb[25].mxu0 }
 0x617   :  { %v1632_v8 = vadd.f32 %v1879_v58, %v1631_v50 }
 0x618   :  { %v1655_v14 = vmin.f32 %v1637_v49, 0.0  ;;  %vm1651_vm2 = vcmp.gt.f32.partialorder %v1637_v49, 0.0 }
 0x619   :  { %v1654_v28 = vmin.f32 %v1632_v8, 0.0  ;;  %v2170_v1 = vpop.f32.mrb[26].mxu0  ;;  %vm1650_vm1 = vcmp.gt.f32.partialorder %v1632_v8, 0.0 }
 0x61a   :  { %v1659_v17 = vmul.f32 0.5, %v1655_v14  ;;  %v1647_v19 = vadd.f32 %v2170_v1, %v1879_v58  ;;  %v1641_v20 = vpop.f32.mrb[27].mxu0 }
 0x61b   :  { %v1658_v24 = vmul.f32 0.5, %v1654_v28  ;;  %v1642_v23 = vadd.f32 %v1879_v58, %v1641_v20 }
 0x61c   :  { %2414 = vtanh.f32 %v1659_v17  ;;  %v1657_v25 = vmin.f32 %v1647_v19, 0.0  ;;  %vm1653_vm4 = vcmp.gt.f32.partialorder %v1647_v19, 0.0 }
 0x61d   :  { %2416 = vtanh.f32 %v1658_v24  ;;  %v1656_v26 = vmin.f32 %v1642_v23, 0.0  ;;  %vm1652_vm3 = vcmp.gt.f32.partialorder %v1642_v23, 0.0 }
 0x61e   :  { %v1661_v22 = vmul.f32 0.5, %v1657_v25 }
 0x61f   :  { %v1660_v21 = vmul.f32 0.5, %v1656_v26 }
 0x620   :  { %2418 = vtanh.f32 %v1661_v22 }
 0x621   :  { %2420 = vtanh.f32 %v1660_v21 }
 0x626   :  { %v2415_v27 = vpop.eup %2414 }
 0x627   :  { %v2417_v29 = vpop.eup %2416  ;;  %v1671_v30 = vsub.f32 1.0, %v2415_v27  ;;  %v1667_v40 = vmul.f32 2.0, %v2415_v27 }
 0x628   :  { %v1670_v32 = vsub.f32 1.0, %v2417_v29  ;;  %v1666_v42 = vmul.f32 2.0, %v2417_v29 }
 0x629   :  { %2422 = vrcp.f32 %v1671_v30 }
 0x62a   :  { %v2419_v35 = vpop.eup %2418  ;;  %2424 = vrcp.f32 %v1670_v32 }
 0x62b   :  { %v2421_v36 = vpop.eup %2420  ;;  %v1673_v38 = vsub.f32 1.0, %v2419_v35  ;;  %v1669_v45 = vmul.f32 2.0, %v2419_v35 }
 0x62c   :  { %v1672_v39 = vsub.f32 1.0, %v2421_v36  ;;  %v1668_v47 = vmul.f32 2.0, %v2421_v36 }
 0x62d   :  { %2426 = vrcp.f32 %v1673_v38 }
 0x62e   :  { %2428 = vrcp.f32 %v1672_v39 }
 0x633   :  { %v2423_v41 = vpop.eup %2422 }
 0x634   :  { %v2425_v43 = vpop.eup %2424  ;;  %v1677_v31 = vmul.f32 %v2423_v41, %v1667_v40 }
 0x635   :  { %v1675_v44 = vmul.f32 %v2425_v43, %v1666_v42 }
 0x636   :  { %v1683_v51 = vsel %vm1651_vm2, %v1637_v49, %v1677_v31 }
 0x637   :  { %v2427_v46 = vpop.eup %2426  ;;  %v1682_v37 = vsel %vm1650_vm1, %v1632_v8, %v1675_v44 }
 0x638   :  { %v2429_v48 = vpop.eup %2428  ;;  %2175 = vmatprep.mubr.msk.f32.mxu1 %vm546_vm6, %v1682_v37  ;;  %v1681_v52 = vmul.f32 %v2427_v46, %v1669_v45 }
 0x639   :  { %2176 = vmatmul.mubr.msk.f32.vlgmr.msra.gmra.mrb[16].mxu1 %vm546_vm6, %v1683_v51  ;;  %v1679_v53 = vmul.f32 %v2429_v48, %v1668_v47 }
 0x63a   :  { %v1685_v56 = vsel %vm1653_vm4, %v1647_v19, %v1681_v52 }
 0x63b   :  { %v1684_v54 = vsel %vm1652_vm3, %v1642_v23, %v1679_v53 }
 0x63c   :  { %2178 = vmatprep.mubr.msk.f32.mxu1 %vm546_vm6, %v1684_v54 }
 0x63d   :  { %2179 = vmatmul.mubr.msk.f32.gmra.mrb[18].mxu1 %vm546_vm6, %v1685_v56 }
 0x70c   :  { %v2177_v59 = vpop.f32.mrb[16].mxu1 }
 0x70d   :  { %v1777_v60 = vadd.f32 %v2177_v59, %v1884_v57  ;;  %v1771_v61 = vpop.f32.mrb[17].mxu1 }
 0x70e   :  { %v1772_v62 = vadd.f32 %v1884_v57, %v1771_v61 }
 0x70f   :  { %v1795_v3 = vmin.f32 %v1777_v60, 0.0  ;;  %vm1791_vm5 = vcmp.gt.f32.partialorder %v1777_v60, 0.0 }
 0x710   :  { %v1794_v4 = vmin.f32 %v1772_v62, 0.0  ;;  %v2180_v5 = vpop.f32.mrb[18].mxu1  ;;  %vm1790_vm7 = vcmp.gt.f32.partialorder %v1772_v62, 0.0 }
 0x711   :  { %v1799_v6 = vmul.f32 0.5, %v1795_v3  ;;  %v1787_v7 = vadd.f32 %v2180_v5, %v1884_v57  ;;  %v1781_v9 = vpop.f32.mrb[19].mxu1 }
 0x712   :  { %v1798_v10 = vmul.f32 0.5, %v1794_v4  ;;  %v1782_v11 = vadd.f32 %v1884_v57, %v1781_v9 }
 0x713   :  { %2430 = vtanh.f32 %v1799_v6  ;;  %v1797_v55 = vmin.f32 %v1787_v7, 0.0  ;;  %vm1793_vm8 = vcmp.gt.f32.partialorder %v1787_v7, 0.0 }
 0x714   :  { %2432 = vtanh.f32 %v1798_v10  ;;  %v1796_v2 = vmin.f32 %v1782_v11, 0.0  ;;  %vm1792_vm9 = vcmp.gt.f32.partialorder %v1782_v11, 0.0 }
 0x715   :  { %v1801_v33 = vmul.f32 0.5, %v1797_v55 }
 0x716   :  { %v1800_v12 = vmul.f32 0.5, %v1796_v2 }
 0x717   :  { %2434 = vtanh.f32 %v1801_v33 }
 0x718   :  { %2436 = vtanh.f32 %v1800_v12 }
 0x71d   :  { %v2431_v13 = vpop.eup %2430 }
 0x71e   :  { %v2433_v63 = vpop.eup %2432  ;;  %v1811_v15 = vsub.f32 1.0, %v2431_v13  ;;  %v1807_v49 = vmul.f32 2.0, %v2431_v13 }
 0x71f   :  { %v1810_v0 = vsub.f32 1.0, %v2433_v63  ;;  %v1806_v8 = vmul.f32 2.0, %v2433_v63 }
 0x720   :  { %2438 = vrcp.f32 %v1811_v15 }
 0x721   :  { %v2435_v16 = vpop.eup %2434  ;;  %2440 = vrcp.f32 %v1810_v0 }
 0x722   :  { %v2437_v18 = vpop.eup %2436  ;;  %v1813_v58 = vsub.f32 1.0, %v2435_v16  ;;  %v1809_v19 = vmul.f32 2.0, %v2435_v16 }
 0x723   :  { %v1812_v34 = vsub.f32 1.0, %v2437_v18  ;;  %v1808_v23 = vmul.f32 2.0, %v2437_v18 }
 0x724   :  { %2442 = vrcp.f32 %v1813_v58 }
 0x725   :  { %2444 = vrcp.f32 %v1812_v34 }
 0x72a   :  { %v2439_v50 = vpop.eup %2438 }
 0x72b   :  { %v2441_v14 = vpop.eup %2440  ;;  %v1817_v28 = vmul.f32 %v2439_v50, %v1807_v49 }
 0x72c   :  { %v1815_v1 = vmul.f32 %v2441_v14, %v1806_v8 }
 0x72d   :  { %v1823_v17 = vsel %vm1791_vm5, %v1777_v60, %v1817_v28 }
 0x72e   :  { %v2443_v20 = vpop.eup %2442  ;;  %1827 = vst.msk [vmem:[%s3069_s4 + $0x8] sm:$0xff] %vm546_vm6, %v1823_v17  ;;  %v1822_v24 = vsel %vm1790_vm7, %v1772_v62, %v1815_v1 }
 0x72f   :  { %v2445_v25 = vpop.eup %2444  ;;  %1826 = vst.msk [vmem:[%s3069_s4] sm:$0xff] %vm546_vm6, %v1822_v24  ;;  %v1821_v26 = vmul.f32 %v2443_v20, %v1809_v19 }
 0x730   :  { %v1819_v22 = vmul.f32 %v2445_v25, %v1808_v23 }
 0x731   :  { %v1825_v21 = vsel %vm1793_vm8, %v1787_v7, %v1821_v26 }
 0x732   :  { %1829 = vst.msk [vmem:[%s3069_s4 + $0x18] sm:$0xff] %vm546_vm6, %v1825_v21  ;;  %v1824_v27 = vsel %vm1792_vm9, %v1782_v11, %v1819_v22 }
 0x733   :  { %1828 = vst.msk [vmem:[%s3069_s4 + $0x10] sm:$0xff] %vm546_vm6, %v1824_v27 }

</bundles_post_ra>
